<compile_context>
chip_gen: v6e
topology: v6e:2x2x1
jax: 0.10.0
libtpu: 0.0.40
codegen_flags: <defaults>
</compile_context>

<pallas_src>
import numpy as np
import jax
import jax.numpy as jnp
from jax.experimental import pallas as pl
from jax.experimental.pallas import tpu as pltpu

# ---------------- config (small synthetic shapes) ----------------
B = 2              # batch
T = 8              # timesteps
HID = 32           # hidden_size
NH = 4             # num_heads
HD = HID // NH     # head dim
INTER = 64         # intermediate_size
EPS = 1e-5
SCALE = HD ** (-0.5)

NCHUNK = HID // HD            # column chunks of HD per projection row (== NH)
ROWS_PER_HEAD = (T * HD) // HID

assert NH * HD == HID
assert (T * HD) % HID == 0    # needed for the clean per-head row structure below


# ---------------- in-kernel helpers ----------------
def _layernorm(x, gamma, beta):
    mean = jnp.mean(x, axis=-1, keepdims=True)
    var = jnp.mean((x - mean) ** 2, axis=-1, keepdims=True)
    return (x - mean) * jax.lax.rsqrt(var + EPS) * gamma + beta


def _gelu_tanh(x):
    c = 0.7978845608028654  # sqrt(2/pi)
    return 0.5 * x * (1.0 + jnp.tanh(c * (x + 0.044715 * x * x * x)))


# ---------------- host-built constant: torch-style head-split operator ----------------
# qh[h*T + t, d] = q_proj[h*ROWS_PER_HEAD + t//NCHUNK, (t % NCHUNK)*HD + d]
# realized as qh = sum_g  L[g] @ q_proj[:, g*HD:(g+1)*HD]
def _make_head_split_matrices():
    L = np.zeros((NCHUNK, NH * T, T), np.float32)
    for h in range(NH):
        for t in range(T):
            g = t % NCHUNK
            r = h * ROWS_PER_HEAD + t // NCHUNK
            L[g, h * T + t, r] = 1.0
    return jnp.asarray(L)


# ---------------- the fused kernel ----------------
def siglip_kernel(x_ref, wqkv_ref, wo_ref, w1_ref, w2_ref, pb_ref, lsel_ref, y_ref):
    # packed per-channel vectors (rows of pb): g1, be1, bq, bk, bv, bo, g2, be2, b2, b1
    pb = pb_ref[...]                                  # (10, INTER)
    g1, be1 = pb[0:1, :HID], pb[1:2, :HID]
    bq, bk, bv = pb[2:3, :HID], pb[3:4, :HID], pb[4:5, :HID]
    bo, g2, be2 = pb[5:6, :HID], pb[6:7, :HID], pb[7:8, :HID]
    b2, b1 = pb[8:9, :HID], pb[9:10, :INTER]

    wq, wk, wv = wqkv_ref[0], wqkv_ref[1], wqkv_ref[2]   # (HID, HID) each
    wo = wo_ref[...]                                     # (HID, HID)
    w1 = w1_ref[...]                                     # (HID, INTER)
    w2 = w2_ref[...]                                     # (INTER, HID)
    lsel = lsel_ref[...]                                 # (NCHUNK, NH*T, T)

    def head_split(p):  # (T, HID) -> (NH*T, HD), torch .view(NH, T, HD) semantics
        acc = jnp.zeros((NH * T, HD), jnp.float32)
        for g in range(NCHUNK):
            acc = acc + jnp.dot(lsel[g], p[:, g * HD:(g + 1) * HD],
                                preferred_element_type=jnp.float32)
        return acc

    for b in range(B):                                   # B=2, statically unrolled
        x = x_ref[b]                                     # (T, HID)

        # --- LN1 + Q/K/V projections ---
        h1 = _layernorm(x, g1, be1)
        qp = jnp.dot(h1, wq, preferred_element_type=jnp.float32) + bq
        kp = jnp.dot(h1, wk, preferred_element_type=jnp.float32) + bk
        vp = jnp.dot(h1, wv, preferred_element_type=jnp.float32) + bv

        qh = head_split(qp)                              # (NH*T, HD)
        kh = head_split(kp)
        vh = head_split(vp)

        # --- per-head attention; head merge fused into the output projection ---
        proj = jnp.zeros((T, HID), jnp.float32)
        for h in range(NH):
            Qh = qh[h * T:(h + 1) * T, :]                # (T, HD)
            Kh = kh[h * T:(h + 1) * T, :]
            Vh = vh[h * T:(h + 1) * T, :]
            s = jnp.einsum('td,sd->ts', Qh, Kh,
                           preferred_element_type=jnp.float32) * SCALE
            s = s - jnp.max(s, axis=-1, keepdims=True)
            p = jnp.exp(s)
            p = p * pl.reciprocal(jnp.sum(p, axis=-1, keepdims=True), approx=False)
            oh = jnp.dot(p, Vh, preferred_element_type=jnp.float32)   # (T, HD)
            # merged[:, h*HD:(h+1)*HD] @ wo  ==  oh @ wo[h*HD:(h+1)*HD, :]
            proj = proj + jnp.dot(oh, wo[h * HD:(h + 1) * HD, :],
                                  preferred_element_type=jnp.float32)

        out1 = proj + bo + x                             # output linear bias + residual

        # --- LN2 + GELU MLP + residual ---
        h2 = _layernorm(out1, g2, be2)
        f = jnp.dot(h2, w1, preferred_element_type=jnp.float32) + b1
        f = _gelu_tanh(f)
        y = jnp.dot(f, w2, preferred_element_type=jnp.float32) + b2
        y_ref[b] = y + out1


# ---------------- wrapper ----------------
def siglip_block(x, params):
    (wq, bq, wk, bk, wv, bv, wo, bo, g1, be1, g2, be2, w1, b1, w2, b2) = params

    # pack weights / per-channel vectors to cut DMA + spec bookkeeping
    wqkv = jnp.stack([wq, wk, wv], axis=0)               # (3, HID, HID)

    def row(v):
        return jnp.pad(v, ((0, 0), (0, INTER - v.shape[1])))
    pb = jnp.concatenate([row(g1), row(be1), row(bq), row(bk), row(bv),
                          row(bo), row(g2), row(be2), row(b2), row(b1)],
                         axis=0)                         # (10, INTER)
    lsel = _make_head_split_matrices()                   # (NCHUNK, NH*T, T)

    full = lambda shape: pl.BlockSpec(shape, lambda i, s=shape: (0,) * len(s))

    y = pl.pallas_call(
        siglip_kernel,
        out_shape=jax.ShapeDtypeStruct((B, T, HID), jnp.float32),
        grid=(1,),                                       # whole problem in one step
        in_specs=[full((B, T, HID)),
                  full((3, HID, HID)),
                  full((HID, HID)),
                  full((HID, INTER)),
                  full((INTER, HID)),
                  full((10, INTER)),
                  full((NCHUNK, NH * T, T))],
        out_specs=full((B, T, HID)),
        compiler_params=pltpu.CompilerParams(dimension_semantics=("arbitrary",)),
    )(x, wqkv, wo, w1, w2, pb, lsel)
    return y


# ---------------- plain-JAX reference (mirrors the PyTorch forward) ----------------
def siglip_block_ref(x, params):
    (wq, bq, wk, bk, wv, bv, wo, bo, g1, be1, g2, be2, w1, b1, w2, b2) = params

    def ln(t, g, b):
        m = jnp.mean(t, -1, keepdims=True)
        v = jnp.mean((t - m) ** 2, -1, keepdims=True)
        return (t - m) / jnp.sqrt(v + EPS) * g + b

    h = ln(x, g1, be1)
    q = h @ wq + bq
    k = h @ wk + bk
    v = h @ wv + bv
    q = q.reshape(B, NH, T, HD)      # torch .view(B, NH, T, HD) on (B, T, HID)
    k = k.reshape(B, NH, T, HD)
    v = v.reshape(B, NH, T, HD)
    att = jnp.einsum('bhtd,bhsd->bhts', q, k) * SCALE
    sc = jax.nn.softmax(att, -1)
    o = jnp.einsum('bhts,bhsd->bhtd', sc, v)
    o = o.transpose(0, 2, 1, 3).reshape(B, T, HID)
    o = o @ wo + bo
    o = o + x
    res = o
    o = ln(o, g2, be2)
    o = o @ w1 + b1
    o = 0.5 * o * (1.0 + jnp.tanh(0.7978845608028654 * (o + 0.044715 * o ** 3)))
    o = o @ w2 + b2
    return o + res


# ---------------- deterministic parameter init ----------------
def make_params(key):
    ks = jax.random.split(key, 10)
    s = 0.05
    wq = jax.random.normal(ks[0], (HID, HID), jnp.float32) * s
    wk = jax.random.normal(ks[1], (HID, HID), jnp.float32) * s
    wv = jax.random.normal(ks[2], (HID, HID), jnp.float32) * s
    wo = jax.random.normal(ks[3], (HID, HID), jnp.float32) * s
    bq = jax.random.normal(ks[4], (1, HID), jnp.float32) * s
    bk = jax.random.normal(ks[5], (1, HID), jnp.float32) * s
    bv = jax.random.normal(ks[6], (1, HID), jnp.float32) * s
    bo = jax.random.normal(ks[7], (1, HID), jnp.float32) * s
    g1 = jnp.ones((1, HID), jnp.float32)
    be1 = jnp.zeros((1, HID), jnp.float32)
    g2 = jnp.ones((1, HID), jnp.float32)
    be2 = jnp.zeros((1, HID), jnp.float32)
    w1 = jax.random.normal(ks[8], (HID, INTER), jnp.float32) * s
    b1 = jnp.zeros((1, INTER), jnp.float32)
    w2 = jax.random.normal(ks[9], (INTER, HID), jnp.float32) * s
    b2 = jnp.zeros((1, HID), jnp.float32)
    return (wq, bq, wk, bk, wv, bv, wo, bo, g1, be1, g2, be2, w1, b1, w2, b2)


if __name__ == "__main__":
    key = jax.random.PRNGKey(0)
    kx, kp = jax.random.split(key)
    x = jax.random.normal(kx, (B, T, HID), jnp.float32)
    params = make_params(kp)

    fn = jax.jit(siglip_block)
    out = jax.block_until_ready(fn(x, params))
    ref = siglip_block_ref(x, params)

    assert out.shape == (B, T, HID)
    err = float(jnp.max(jnp.abs(out - ref)))
    assert err < 1e-4, err
    print("KERNEL_OK")
</pallas_src>

<mosaic_0001>
module attributes {stable_mosaic.version = 11 : i64} {
  func.func @siglip_kernel(%arg0: i32, %arg1: memref<2x8x32xf32, #tpu.memory_space<vmem>>, %arg2: memref<3x32x32xf32, #tpu.memory_space<vmem>>, %arg3: memref<32x32xf32, #tpu.memory_space<vmem>>, %arg4: memref<32x64xf32, #tpu.memory_space<vmem>>, %arg5: memref<64x32xf32, #tpu.memory_space<vmem>>, %arg6: memref<10x64xf32, #tpu.memory_space<vmem>>, %arg7: memref<4x32x8xf32, #tpu.memory_space<vmem>>, %arg8: memref<2x8x32xf32, #tpu.memory_space<vmem>>) attributes {dimension_semantics = [#tpu.dimension_semantics<arbitrary>], iteration_bounds = array<i64: 1>, scalar_prefetch = 0 : i64, scratch_operands = 0 : i64, tpu.core_type = #tpu.core_type<tc>, window_params = [{pipeline_mode = #tpu.pipeline_mode<synchronous>, transform_indices = @transform_0, window_bounds = array<i64: 2, 8, 32>}, {pipeline_mode = #tpu.pipeline_mode<synchronous>, transform_indices = @transform_1, window_bounds = array<i64: 3, 32, 32>}, {pipeline_mode = #tpu.pipeline_mode<synchronous>, transform_indices = @transform_2, window_bounds = array<i64: 32, 32>}, {pipeline_mode = #tpu.pipeline_mode<synchronous>, transform_indices = @transform_3, window_bounds = array<i64: 32, 64>}, {pipeline_mode = #tpu.pipeline_mode<synchronous>, transform_indices = @transform_4, window_bounds = array<i64: 64, 32>}, {pipeline_mode = #tpu.pipeline_mode<synchronous>, transform_indices = @transform_5, window_bounds = array<i64: 10, 64>}, {pipeline_mode = #tpu.pipeline_mode<synchronous>, transform_indices = @transform_6, window_bounds = array<i64: 4, 32, 8>}, {pipeline_mode = #tpu.pipeline_mode<synchronous>, transform_indices = @transform_7, window_bounds = array<i64: 2, 8, 32>}]} {
    %c0 = arith.constant 0 : index
    %c0_0 = arith.constant 0 : index
    %0 = vector.load %arg6[%c0, %c0_0] : memref<10x64xf32, #tpu.memory_space<vmem>>, vector<10x64xf32>
    %1 = vector.extract_strided_slice %0 {offsets = [0, 0], sizes = [1, 32], strides = [1, 1]} : vector<10x64xf32> to vector<1x32xf32>
    %2 = vector.extract_strided_slice %0 {offsets = [1, 0], sizes = [1, 32], strides = [1, 1]} : vector<10x64xf32> to vector<1x32xf32>
    %3 = vector.extract_strided_slice %0 {offsets = [2, 0], sizes = [1, 32], strides = [1, 1]} : vector<10x64xf32> to vector<1x32xf32>
    %4 = vector.extract_strided_slice %0 {offsets = [3, 0], sizes = [1, 32], strides = [1, 1]} : vector<10x64xf32> to vector<1x32xf32>
    %5 = vector.extract_strided_slice %0 {offsets = [4, 0], sizes = [1, 32], strides = [1, 1]} : vector<10x64xf32> to vector<1x32xf32>
    %6 = vector.extract_strided_slice %0 {offsets = [5, 0], sizes = [1, 32], strides = [1, 1]} : vector<10x64xf32> to vector<1x32xf32>
    %7 = vector.extract_strided_slice %0 {offsets = [6, 0], sizes = [1, 32], strides = [1, 1]} : vector<10x64xf32> to vector<1x32xf32>
    %8 = vector.extract_strided_slice %0 {offsets = [7, 0], sizes = [1, 32], strides = [1, 1]} : vector<10x64xf32> to vector<1x32xf32>
    %9 = vector.extract_strided_slice %0 {offsets = [8, 0], sizes = [1, 32], strides = [1, 1]} : vector<10x64xf32> to vector<1x32xf32>
    %10 = vector.extract_strided_slice %0 {offsets = [9, 0], sizes = [1, 64], strides = [1, 1]} : vector<10x64xf32> to vector<1x64xf32>
    %c0_1 = arith.constant 0 : index
    %c0_2 = arith.constant 0 : index
    %c0_3 = arith.constant 0 : index
    %11 = vector.load %arg2[%c0_1, %c0_2, %c0_3] : memref<3x32x32xf32, #tpu.memory_space<vmem>>, vector<1x32x32xf32>
    %12 = vector.shape_cast %11 : vector<1x32x32xf32> to vector<32x32xf32>
    %c1 = arith.constant 1 : index
    %c0_4 = arith.constant 0 : index
    %c0_5 = arith.constant 0 : index
    %13 = vector.load %arg2[%c1, %c0_4, %c0_5] : memref<3x32x32xf32, #tpu.memory_space<vmem>>, vector<1x32x32xf32>
    %14 = vector.shape_cast %13 : vector<1x32x32xf32> to vector<32x32xf32>
    %c2 = arith.constant 2 : index
    %c0_6 = arith.constant 0 : index
    %c0_7 = arith.constant 0 : index
    %15 = vector.load %arg2[%c2, %c0_6, %c0_7] : memref<3x32x32xf32, #tpu.memory_space<vmem>>, vector<1x32x32xf32>
    %16 = vector.shape_cast %15 : vector<1x32x32xf32> to vector<32x32xf32>
    %c0_8 = arith.constant 0 : index
    %c0_9 = arith.constant 0 : index
    %17 = vector.load %arg3[%c0_8, %c0_9] : memref<32x32xf32, #tpu.memory_space<vmem>>, vector<32x32xf32>
    %c0_10 = arith.constant 0 : index
    %c0_11 = arith.constant 0 : index
    %18 = vector.load %arg4[%c0_10, %c0_11] : memref<32x64xf32, #tpu.memory_space<vmem>>, vector<32x64xf32>
    %c0_12 = arith.constant 0 : index
    %c0_13 = arith.constant 0 : index
    %19 = vector.load %arg5[%c0_12, %c0_13] : memref<64x32xf32, #tpu.memory_space<vmem>>, vector<64x32xf32>
    %c0_14 = arith.constant 0 : index
    %c0_15 = arith.constant 0 : index
    %c0_16 = arith.constant 0 : index
    %20 = vector.load %arg7[%c0_14, %c0_15, %c0_16] : memref<4x32x8xf32, #tpu.memory_space<vmem>>, vector<4x32x8xf32>
    %c0_17 = arith.constant 0 : index
    %c0_18 = arith.constant 0 : index
    %c0_19 = arith.constant 0 : index
    %21 = vector.load %arg1[%c0_17, %c0_18, %c0_19] : memref<2x8x32xf32, #tpu.memory_space<vmem>>, vector<1x8x32xf32>
    %22 = vector.shape_cast %21 : vector<1x8x32xf32> to vector<8x32xf32>
    %cst = arith.constant dense<0.000000e+00> : vector<8xf32>
    %23 = vector.multi_reduction <add>, %22, %cst [1] : vector<8x32xf32> to vector<8xf32>
    %24 = vector.shape_cast %23 : vector<8xf32> to vector<8x1xf32>
    %cst_20 = arith.constant 3.200000e+01 : f32
    %25 = vector.broadcast %cst_20 : f32 to vector<8x1xf32>
    %26 = arith.divf %24, %25 : vector<8x1xf32>
    %27 = vector.broadcast %26 : vector<8x1xf32> to vector<8x32xf32>
    %28 = arith.subf %22, %27 : vector<8x32xf32>
    %29 = arith.mulf %28, %28 : vector<8x32xf32>
    %cst_21 = arith.constant dense<0.000000e+00> : vector<8xf32>
    %30 = vector.multi_reduction <add>, %29, %cst_21 [1] : vector<8x32xf32> to vector<8xf32>
    %31 = vector.shape_cast %30 : vector<8xf32> to vector<8x1xf32>
    %cst_22 = arith.constant 3.200000e+01 : f32
    %32 = vector.broadcast %cst_22 : f32 to vector<8x1xf32>
    %33 = arith.divf %31, %32 : vector<8x1xf32>
    %34 = vector.broadcast %26 : vector<8x1xf32> to vector<8x32xf32>
    %35 = arith.subf %22, %34 : vector<8x32xf32>
    %cst_23 = arith.constant 9.99999974E-6 : f32
    %36 = vector.broadcast %cst_23 : f32 to vector<8x1xf32>
    %37 = arith.addf %33, %36 : vector<8x1xf32>
    %38 = math.rsqrt %37 : vector<8x1xf32>
    %39 = vector.broadcast %38 : vector<8x1xf32> to vector<8x32xf32>
    %40 = arith.mulf %35, %39 : vector<8x32xf32>
    %41 = vector.broadcast %1 : vector<1x32xf32> to vector<8x32xf32>
    %42 = arith.mulf %40, %41 : vector<8x32xf32>
    %43 = vector.broadcast %2 : vector<1x32xf32> to vector<8x32xf32>
    %44 = arith.addf %42, %43 : vector<8x32xf32>
    %cst_24 = arith.constant dense<0.000000e+00> : vector<8x32xf32>
    %45 = tpu.matmul %44, %12, %cst_24 {dimension_numbers = #tpu.dot_dimension_numbers<[1], [0], [0], [1], [0, 0, 1, 1], [], []>} : vector<8x32xf32>, vector<32x32xf32>, vector<8x32xf32> -> vector<8x32xf32>
    %46 = vector.broadcast %3 : vector<1x32xf32> to vector<8x32xf32>
    %47 = arith.addf %45, %46 : vector<8x32xf32>
    %cst_25 = arith.constant dense<0.000000e+00> : vector<8x32xf32>
    %48 = tpu.matmul %44, %14, %cst_25 {dimension_numbers = #tpu.dot_dimension_numbers<[1], [0], [0], [1], [0, 0, 1, 1], [], []>} : vector<8x32xf32>, vector<32x32xf32>, vector<8x32xf32> -> vector<8x32xf32>
    %49 = vector.broadcast %4 : vector<1x32xf32> to vector<8x32xf32>
    %50 = arith.addf %48, %49 : vector<8x32xf32>
    %cst_26 = arith.constant dense<0.000000e+00> : vector<8x32xf32>
    %51 = tpu.matmul %44, %16, %cst_26 {dimension_numbers = #tpu.dot_dimension_numbers<[1], [0], [0], [1], [0, 0, 1, 1], [], []>} : vector<8x32xf32>, vector<32x32xf32>, vector<8x32xf32> -> vector<8x32xf32>
    %52 = vector.broadcast %5 : vector<1x32xf32> to vector<8x32xf32>
    %53 = arith.addf %51, %52 : vector<8x32xf32>
    %cst_27 = arith.constant 0.000000e+00 : f32
    %54 = vector.broadcast %cst_27 : f32 to vector<32x8xf32>
    %55 = vector.extract_strided_slice %20 {offsets = [0, 0, 0], sizes = [1, 32, 8], strides = [1, 1, 1]} : vector<4x32x8xf32> to vector<1x32x8xf32>
    %56 = vector.shape_cast %55 : vector<1x32x8xf32> to vector<32x8xf32>
    %57 = vector.extract_strided_slice %47 {offsets = [0, 0], sizes = [8, 8], strides = [1, 1]} : vector<8x32xf32> to vector<8x8xf32>
    %cst_28 = arith.constant dense<0.000000e+00> : vector<32x8xf32>
    %58 = tpu.matmul %56, %57, %cst_28 {dimension_numbers = #tpu.dot_dimension_numbers<[1], [0], [0], [1], [0, 0, 1, 1], [], []>} : vector<32x8xf32>, vector<8x8xf32>, vector<32x8xf32> -> vector<32x8xf32>
    %59 = arith.addf %54, %58 : vector<32x8xf32>
    %60 = vector.extract_strided_slice %20 {offsets = [1, 0, 0], sizes = [1, 32, 8], strides = [1, 1, 1]} : vector<4x32x8xf32> to vector<1x32x8xf32>
    %61 = vector.shape_cast %60 : vector<1x32x8xf32> to vector<32x8xf32>
    %62 = vector.extract_strided_slice %47 {offsets = [0, 8], sizes = [8, 8], strides = [1, 1]} : vector<8x32xf32> to vector<8x8xf32>
    %cst_29 = arith.constant dense<0.000000e+00> : vector<32x8xf32>
    %63 = tpu.matmul %61, %62, %cst_29 {dimension_numbers = #tpu.dot_dimension_numbers<[1], [0], [0], [1], [0, 0, 1, 1], [], []>} : vector<32x8xf32>, vector<8x8xf32>, vector<32x8xf32> -> vector<32x8xf32>
    %64 = arith.addf %59, %63 : vector<32x8xf32>
    %65 = vector.extract_strided_slice %20 {offsets = [2, 0, 0], sizes = [1, 32, 8], strides = [1, 1, 1]} : vector<4x32x8xf32> to vector<1x32x8xf32>
    %66 = vector.shape_cast %65 : vector<1x32x8xf32> to vector<32x8xf32>
    %67 = vector.extract_strided_slice %47 {offsets = [0, 16], sizes = [8, 8], strides = [1, 1]} : vector<8x32xf32> to vector<8x8xf32>
    %cst_30 = arith.constant dense<0.000000e+00> : vector<32x8xf32>
    %68 = tpu.matmul %66, %67, %cst_30 {dimension_numbers = #tpu.dot_dimension_numbers<[1], [0], [0], [1], [0, 0, 1, 1], [], []>} : vector<32x8xf32>, vector<8x8xf32>, vector<32x8xf32> -> vector<32x8xf32>
    %69 = arith.addf %64, %68 : vector<32x8xf32>
    %70 = vector.extract_strided_slice %20 {offsets = [3, 0, 0], sizes = [1, 32, 8], strides = [1, 1, 1]} : vector<4x32x8xf32> to vector<1x32x8xf32>
    %71 = vector.shape_cast %70 : vector<1x32x8xf32> to vector<32x8xf32>
    %72 = vector.extract_strided_slice %47 {offsets = [0, 24], sizes = [8, 8], strides = [1, 1]} : vector<8x32xf32> to vector<8x8xf32>
    %cst_31 = arith.constant dense<0.000000e+00> : vector<32x8xf32>
    %73 = tpu.matmul %71, %72, %cst_31 {dimension_numbers = #tpu.dot_dimension_numbers<[1], [0], [0], [1], [0, 0, 1, 1], [], []>} : vector<32x8xf32>, vector<8x8xf32>, vector<32x8xf32> -> vector<32x8xf32>
    %74 = arith.addf %69, %73 : vector<32x8xf32>
    %cst_32 = arith.constant 0.000000e+00 : f32
    %75 = vector.broadcast %cst_32 : f32 to vector<32x8xf32>
    %76 = vector.extract_strided_slice %20 {offsets = [0, 0, 0], sizes = [1, 32, 8], strides = [1, 1, 1]} : vector<4x32x8xf32> to vector<1x32x8xf32>
    %77 = vector.shape_cast %76 : vector<1x32x8xf32> to vector<32x8xf32>
    %78 = vector.extract_strided_slice %50 {offsets = [0, 0], sizes = [8, 8], strides = [1, 1]} : vector<8x32xf32> to vector<8x8xf32>
    %cst_33 = arith.constant dense<0.000000e+00> : vector<32x8xf32>
    %79 = tpu.matmul %77, %78, %cst_33 {dimension_numbers = #tpu.dot_dimension_numbers<[1], [0], [0], [1], [0, 0, 1, 1], [], []>} : vector<32x8xf32>, vector<8x8xf32>, vector<32x8xf32> -> vector<32x8xf32>
    %80 = arith.addf %75, %79 : vector<32x8xf32>
    %81 = vector.extract_strided_slice %20 {offsets = [1, 0, 0], sizes = [1, 32, 8], strides = [1, 1, 1]} : vector<4x32x8xf32> to vector<1x32x8xf32>
    %82 = vector.shape_cast %81 : vector<1x32x8xf32> to vector<32x8xf32>
    %83 = vector.extract_strided_slice %50 {offsets = [0, 8], sizes = [8, 8], strides = [1, 1]} : vector<8x32xf32> to vector<8x8xf32>
    %cst_34 = arith.constant dense<0.000000e+00> : vector<32x8xf32>
    %84 = tpu.matmul %82, %83, %cst_34 {dimension_numbers = #tpu.dot_dimension_numbers<[1], [0], [0], [1], [0, 0, 1, 1], [], []>} : vector<32x8xf32>, vector<8x8xf32>, vector<32x8xf32> -> vector<32x8xf32>
    %85 = arith.addf %80, %84 : vector<32x8xf32>
    %86 = vector.extract_strided_slice %20 {offsets = [2, 0, 0], sizes = [1, 32, 8], strides = [1, 1, 1]} : vector<4x32x8xf32> to vector<1x32x8xf32>
    %87 = vector.shape_cast %86 : vector<1x32x8xf32> to vector<32x8xf32>
    %88 = vector.extract_strided_slice %50 {offsets = [0, 16], sizes = [8, 8], strides = [1, 1]} : vector<8x32xf32> to vector<8x8xf32>
    %cst_35 = arith.constant dense<0.000000e+00> : vector<32x8xf32>
    %89 = tpu.matmul %87, %88, %cst_35 {dimension_numbers = #tpu.dot_dimension_numbers<[1], [0], [0], [1], [0, 0, 1, 1], [], []>} : vector<32x8xf32>, vector<8x8xf32>, vector<32x8xf32> -> vector<32x8xf32>
    %90 = arith.addf %85, %89 : vector<32x8xf32>
    %91 = vector.extract_strided_slice %20 {offsets = [3, 0, 0], sizes = [1, 32, 8], strides = [1, 1, 1]} : vector<4x32x8xf32> to vector<1x32x8xf32>
    %92 = vector.shape_cast %91 : vector<1x32x8xf32> to vector<32x8xf32>
    %93 = vector.extract_strided_slice %50 {offsets = [0, 24], sizes = [8, 8], strides = [1, 1]} : vector<8x32xf32> to vector<8x8xf32>
    %cst_36 = arith.constant dense<0.000000e+00> : vector<32x8xf32>
    %94 = tpu.matmul %92, %93, %cst_36 {dimension_numbers = #tpu.dot_dimension_numbers<[1], [0], [0], [1], [0, 0, 1, 1], [], []>} : vector<32x8xf32>, vector<8x8xf32>, vector<32x8xf32> -> vector<32x8xf32>
    %95 = arith.addf %90, %94 : vector<32x8xf32>
    %cst_37 = arith.constant 0.000000e+00 : f32
    %96 = vector.broadcast %cst_37 : f32 to vector<32x8xf32>
    %97 = vector.extract_strided_slice %20 {offsets = [0, 0, 0], sizes = [1, 32, 8], strides = [1, 1, 1]} : vector<4x32x8xf32> to vector<1x32x8xf32>
    %98 = vector.shape_cast %97 : vector<1x32x8xf32> to vector<32x8xf32>
    %99 = vector.extract_strided_slice %53 {offsets = [0, 0], sizes = [8, 8], strides = [1, 1]} : vector<8x32xf32> to vector<8x8xf32>
    %cst_38 = arith.constant dense<0.000000e+00> : vector<32x8xf32>
    %100 = tpu.matmul %98, %99, %cst_38 {dimension_numbers = #tpu.dot_dimension_numbers<[1], [0], [0], [1], [0, 0, 1, 1], [], []>} : vector<32x8xf32>, vector<8x8xf32>, vector<32x8xf32> -> vector<32x8xf32>
    %101 = arith.addf %96, %100 : vector<32x8xf32>
    %102 = vector.extract_strided_slice %20 {offsets = [1, 0, 0], sizes = [1, 32, 8], strides = [1, 1, 1]} : vector<4x32x8xf32> to vector<1x32x8xf32>
    %103 = vector.shape_cast %102 : vector<1x32x8xf32> to vector<32x8xf32>
    %104 = vector.extract_strided_slice %53 {offsets = [0, 8], sizes = [8, 8], strides = [1, 1]} : vector<8x32xf32> to vector<8x8xf32>
    %cst_39 = arith.constant dense<0.000000e+00> : vector<32x8xf32>
    %105 = tpu.matmul %103, %104, %cst_39 {dimension_numbers = #tpu.dot_dimension_numbers<[1], [0], [0], [1], [0, 0, 1, 1], [], []>} : vector<32x8xf32>, vector<8x8xf32>, vector<32x8xf32> -> vector<32x8xf32>
    %106 = arith.addf %101, %105 : vector<32x8xf32>
    %107 = vector.extract_strided_slice %20 {offsets = [2, 0, 0], sizes = [1, 32, 8], strides = [1, 1, 1]} : vector<4x32x8xf32> to vector<1x32x8xf32>
    %108 = vector.shape_cast %107 : vector<1x32x8xf32> to vector<32x8xf32>
    %109 = vector.extract_strided_slice %53 {offsets = [0, 16], sizes = [8, 8], strides = [1, 1]} : vector<8x32xf32> to vector<8x8xf32>
    %cst_40 = arith.constant dense<0.000000e+00> : vector<32x8xf32>
    %110 = tpu.matmul %108, %109, %cst_40 {dimension_numbers = #tpu.dot_dimension_numbers<[1], [0], [0], [1], [0, 0, 1, 1], [], []>} : vector<32x8xf32>, vector<8x8xf32>, vector<32x8xf32> -> vector<32x8xf32>
    %111 = arith.addf %106, %110 : vector<32x8xf32>
    %112 = vector.extract_strided_slice %20 {offsets = [3, 0, 0], sizes = [1, 32, 8], strides = [1, 1, 1]} : vector<4x32x8xf32> to vector<1x32x8xf32>
    %113 = vector.shape_cast %112 : vector<1x32x8xf32> to vector<32x8xf32>
    %114 = vector.extract_strided_slice %53 {offsets = [0, 24], sizes = [8, 8], strides = [1, 1]} : vector<8x32xf32> to vector<8x8xf32>
    %cst_41 = arith.constant dense<0.000000e+00> : vector<32x8xf32>
    %115 = tpu.matmul %113, %114, %cst_41 {dimension_numbers = #tpu.dot_dimension_numbers<[1], [0], [0], [1], [0, 0, 1, 1], [], []>} : vector<32x8xf32>, vector<8x8xf32>, vector<32x8xf32> -> vector<32x8xf32>
    %116 = arith.addf %111, %115 : vector<32x8xf32>
    %cst_42 = arith.constant 0.000000e+00 : f32
    %117 = vector.broadcast %cst_42 : f32 to vector<8x32xf32>
    %118 = vector.extract_strided_slice %74 {offsets = [0, 0], sizes = [8, 8], strides = [1, 1]} : vector<32x8xf32> to vector<8x8xf32>
    %119 = vector.extract_strided_slice %95 {offsets = [0, 0], sizes = [8, 8], strides = [1, 1]} : vector<32x8xf32> to vector<8x8xf32>
    %120 = vector.extract_strided_slice %116 {offsets = [0, 0], sizes = [8, 8], strides = [1, 1]} : vector<32x8xf32> to vector<8x8xf32>
    "tpu.trace_start"() <{level = 10 : i32, message = "td,sd->ts"}> : () -> ()
    %cst_43 = arith.constant dense<0.000000e+00> : vector<8x8xf32>
    %121 = tpu.matmul %118, %119, %cst_43 {dimension_numbers = #tpu.dot_dimension_numbers<[1], [1], [0], [0], [0, 0, 1, 0], [], []>} : vector<8x8xf32>, vector<8x8xf32>, vector<8x8xf32> -> vector<8x8xf32>
    "tpu.trace_stop"() : () -> ()
    %cst_44 = arith.constant 0.353553385 : f32
    %122 = vector.broadcast %cst_44 : f32 to vector<8x8xf32>
    %123 = arith.mulf %121, %122 : vector<8x8xf32>
    %cst_45 = arith.constant dense<0xFF800000> : vector<8xf32>
    %124 = vector.multi_reduction <maximumf>, %123, %cst_45 [1] : vector<8x8xf32> to vector<8xf32>
    %125 = vector.shape_cast %124 : vector<8xf32> to vector<8x1xf32>
    %126 = vector.broadcast %125 : vector<8x1xf32> to vector<8x8xf32>
    %127 = arith.subf %123, %126 : vector<8x8xf32>
    %128 = math.exp %127 : vector<8x8xf32>
    %cst_46 = arith.constant dense<0.000000e+00> : vector<8xf32>
    %129 = vector.multi_reduction <add>, %128, %cst_46 [1] : vector<8x8xf32> to vector<8xf32>
    %130 = vector.shape_cast %129 : vector<8xf32> to vector<8x1xf32>
    %131 = tpu.reciprocal %130 : vector<8x1xf32> -> vector<8x1xf32>
    %132 = vector.broadcast %131 : vector<8x1xf32> to vector<8x8xf32>
    %133 = arith.mulf %128, %132 : vector<8x8xf32>
    %cst_47 = arith.constant dense<0.000000e+00> : vector<8x8xf32>
    %134 = tpu.matmul %133, %120, %cst_47 {dimension_numbers = #tpu.dot_dimension_numbers<[1], [0], [0], [1], [0, 0, 1, 1], [], []>} : vector<8x8xf32>, vector<8x8xf32>, vector<8x8xf32> -> vector<8x8xf32>
    %135 = vector.extract_strided_slice %17 {offsets = [0, 0], sizes = [8, 32], strides = [1, 1]} : vector<32x32xf32> to vector<8x32xf32>
    %cst_48 = arith.constant dense<0.000000e+00> : vector<8x32xf32>
    %136 = tpu.matmul %134, %135, %cst_48 {dimension_numbers = #tpu.dot_dimension_numbers<[1], [0], [0], [1], [0, 0, 1, 1], [], []>} : vector<8x8xf32>, vector<8x32xf32>, vector<8x32xf32> -> vector<8x32xf32>
    %137 = arith.addf %117, %136 : vector<8x32xf32>
    %138 = vector.extract_strided_slice %74 {offsets = [8, 0], sizes = [8, 8], strides = [1, 1]} : vector<32x8xf32> to vector<8x8xf32>
    %139 = vector.extract_strided_slice %95 {offsets = [8, 0], sizes = [8, 8], strides = [1, 1]} : vector<32x8xf32> to vector<8x8xf32>
    %140 = vector.extract_strided_slice %116 {offsets = [8, 0], sizes = [8, 8], strides = [1, 1]} : vector<32x8xf32> to vector<8x8xf32>
    "tpu.trace_start"() <{level = 10 : i32, message = "td,sd->ts"}> : () -> ()
    %cst_49 = arith.constant dense<0.000000e+00> : vector<8x8xf32>
    %141 = tpu.matmul %138, %139, %cst_49 {dimension_numbers = #tpu.dot_dimension_numbers<[1], [1], [0], [0], [0, 0, 1, 0], [], []>} : vector<8x8xf32>, vector<8x8xf32>, vector<8x8xf32> -> vector<8x8xf32>
    "tpu.trace_stop"() : () -> ()
    %cst_50 = arith.constant 0.353553385 : f32
    %142 = vector.broadcast %cst_50 : f32 to vector<8x8xf32>
    %143 = arith.mulf %141, %142 : vector<8x8xf32>
    %cst_51 = arith.constant dense<0xFF800000> : vector<8xf32>
    %144 = vector.multi_reduction <maximumf>, %143, %cst_51 [1] : vector<8x8xf32> to vector<8xf32>
    %145 = vector.shape_cast %144 : vector<8xf32> to vector<8x1xf32>
    %146 = vector.broadcast %145 : vector<8x1xf32> to vector<8x8xf32>
    %147 = arith.subf %143, %146 : vector<8x8xf32>
    %148 = math.exp %147 : vector<8x8xf32>
    %cst_52 = arith.constant dense<0.000000e+00> : vector<8xf32>
    %149 = vector.multi_reduction <add>, %148, %cst_52 [1] : vector<8x8xf32> to vector<8xf32>
    %150 = vector.shape_cast %149 : vector<8xf32> to vector<8x1xf32>
    %151 = tpu.reciprocal %150 : vector<8x1xf32> -> vector<8x1xf32>
    %152 = vector.broadcast %151 : vector<8x1xf32> to vector<8x8xf32>
    %153 = arith.mulf %148, %152 : vector<8x8xf32>
    %cst_53 = arith.constant dense<0.000000e+00> : vector<8x8xf32>
    %154 = tpu.matmul %153, %140, %cst_53 {dimension_numbers = #tpu.dot_dimension_numbers<[1], [0], [0], [1], [0, 0, 1, 1], [], []>} : vector<8x8xf32>, vector<8x8xf32>, vector<8x8xf32> -> vector<8x8xf32>
    %155 = vector.extract_strided_slice %17 {offsets = [8, 0], sizes = [8, 32], strides = [1, 1]} : vector<32x32xf32> to vector<8x32xf32>
    %cst_54 = arith.constant dense<0.000000e+00> : vector<8x32xf32>
    %156 = tpu.matmul %154, %155, %cst_54 {dimension_numbers = #tpu.dot_dimension_numbers<[1], [0], [0], [1], [0, 0, 1, 1], [], []>} : vector<8x8xf32>, vector<8x32xf32>, vector<8x32xf32> -> vector<8x32xf32>
    %157 = arith.addf %137, %156 : vector<8x32xf32>
    %158 = vector.extract_strided_slice %74 {offsets = [16, 0], sizes = [8, 8], strides = [1, 1]} : vector<32x8xf32> to vector<8x8xf32>
    %159 = vector.extract_strided_slice %95 {offsets = [16, 0], sizes = [8, 8], strides = [1, 1]} : vector<32x8xf32> to vector<8x8xf32>
    %160 = vector.extract_strided_slice %116 {offsets = [16, 0], sizes = [8, 8], strides = [1, 1]} : vector<32x8xf32> to vector<8x8xf32>
    "tpu.trace_start"() <{level = 10 : i32, message = "td,sd->ts"}> : () -> ()
    %cst_55 = arith.constant dense<0.000000e+00> : vector<8x8xf32>
    %161 = tpu.matmul %158, %159, %cst_55 {dimension_numbers = #tpu.dot_dimension_numbers<[1], [1], [0], [0], [0, 0, 1, 0], [], []>} : vector<8x8xf32>, vector<8x8xf32>, vector<8x8xf32> -> vector<8x8xf32>
    "tpu.trace_stop"() : () -> ()
    %cst_56 = arith.constant 0.353553385 : f32
    %162 = vector.broadcast %cst_56 : f32 to vector<8x8xf32>
    %163 = arith.mulf %161, %162 : vector<8x8xf32>
    %cst_57 = arith.constant dense<0xFF800000> : vector<8xf32>
    %164 = vector.multi_reduction <maximumf>, %163, %cst_57 [1] : vector<8x8xf32> to vector<8xf32>
    %165 = vector.shape_cast %164 : vector<8xf32> to vector<8x1xf32>
    %166 = vector.broadcast %165 : vector<8x1xf32> to vector<8x8xf32>
    %167 = arith.subf %163, %166 : vector<8x8xf32>
    %168 = math.exp %167 : vector<8x8xf32>
    %cst_58 = arith.constant dense<0.000000e+00> : vector<8xf32>
    %169 = vector.multi_reduction <add>, %168, %cst_58 [1] : vector<8x8xf32> to vector<8xf32>
    %170 = vector.shape_cast %169 : vector<8xf32> to vector<8x1xf32>
    %171 = tpu.reciprocal %170 : vector<8x1xf32> -> vector<8x1xf32>
    %172 = vector.broadcast %171 : vector<8x1xf32> to vector<8x8xf32>
    %173 = arith.mulf %168, %172 : vector<8x8xf32>
    %cst_59 = arith.constant dense<0.000000e+00> : vector<8x8xf32>
    %174 = tpu.matmul %173, %160, %cst_59 {dimension_numbers = #tpu.dot_dimension_numbers<[1], [0], [0], [1], [0, 0, 1, 1], [], []>} : vector<8x8xf32>, vector<8x8xf32>, vector<8x8xf32> -> vector<8x8xf32>
    %175 = vector.extract_strided_slice %17 {offsets = [16, 0], sizes = [8, 32], strides = [1, 1]} : vector<32x32xf32> to vector<8x32xf32>
    %cst_60 = arith.constant dense<0.000000e+00> : vector<8x32xf32>
    %176 = tpu.matmul %174, %175, %cst_60 {dimension_numbers = #tpu.dot_dimension_numbers<[1], [0], [0], [1], [0, 0, 1, 1], [], []>} : vector<8x8xf32>, vector<8x32xf32>, vector<8x32xf32> -> vector<8x32xf32>
    %177 = arith.addf %157, %176 : vector<8x32xf32>
    %178 = vector.extract_strided_slice %74 {offsets = [24, 0], sizes = [8, 8], strides = [1, 1]} : vector<32x8xf32> to vector<8x8xf32>
    %179 = vector.extract_strided_slice %95 {offsets = [24, 0], sizes = [8, 8], strides = [1, 1]} : vector<32x8xf32> to vector<8x8xf32>
    %180 = vector.extract_strided_slice %116 {offsets = [24, 0], sizes = [8, 8], strides = [1, 1]} : vector<32x8xf32> to vector<8x8xf32>
    "tpu.trace_start"() <{level = 10 : i32, message = "td,sd->ts"}> : () -> ()
    %cst_61 = arith.constant dense<0.000000e+00> : vector<8x8xf32>
    %181 = tpu.matmul %178, %179, %cst_61 {dimension_numbers = #tpu.dot_dimension_numbers<[1], [1], [0], [0], [0, 0, 1, 0], [], []>} : vector<8x8xf32>, vector<8x8xf32>, vector<8x8xf32> -> vector<8x8xf32>
    "tpu.trace_stop"() : () -> ()
    %cst_62 = arith.constant 0.353553385 : f32
    %182 = vector.broadcast %cst_62 : f32 to vector<8x8xf32>
    %183 = arith.mulf %181, %182 : vector<8x8xf32>
    %cst_63 = arith.constant dense<0xFF800000> : vector<8xf32>
    %184 = vector.multi_reduction <maximumf>, %183, %cst_63 [1] : vector<8x8xf32> to vector<8xf32>
    %185 = vector.shape_cast %184 : vector<8xf32> to vector<8x1xf32>
    %186 = vector.broadcast %185 : vector<8x1xf32> to vector<8x8xf32>
    %187 = arith.subf %183, %186 : vector<8x8xf32>
    %188 = math.exp %187 : vector<8x8xf32>
    %cst_64 = arith.constant dense<0.000000e+00> : vector<8xf32>
    %189 = vector.multi_reduction <add>, %188, %cst_64 [1] : vector<8x8xf32> to vector<8xf32>
    %190 = vector.shape_cast %189 : vector<8xf32> to vector<8x1xf32>
    %191 = tpu.reciprocal %190 : vector<8x1xf32> -> vector<8x1xf32>
    %192 = vector.broadcast %191 : vector<8x1xf32> to vector<8x8xf32>
    %193 = arith.mulf %188, %192 : vector<8x8xf32>
    %cst_65 = arith.constant dense<0.000000e+00> : vector<8x8xf32>
    %194 = tpu.matmul %193, %180, %cst_65 {dimension_numbers = #tpu.dot_dimension_numbers<[1], [0], [0], [1], [0, 0, 1, 1], [], []>} : vector<8x8xf32>, vector<8x8xf32>, vector<8x8xf32> -> vector<8x8xf32>
    %195 = vector.extract_strided_slice %17 {offsets = [24, 0], sizes = [8, 32], strides = [1, 1]} : vector<32x32xf32> to vector<8x32xf32>
    %cst_66 = arith.constant dense<0.000000e+00> : vector<8x32xf32>
    %196 = tpu.matmul %194, %195, %cst_66 {dimension_numbers = #tpu.dot_dimension_numbers<[1], [0], [0], [1], [0, 0, 1, 1], [], []>} : vector<8x8xf32>, vector<8x32xf32>, vector<8x32xf32> -> vector<8x32xf32>
    %197 = arith.addf %177, %196 : vector<8x32xf32>
    %198 = vector.broadcast %6 : vector<1x32xf32> to vector<8x32xf32>
    %199 = arith.addf %197, %198 : vector<8x32xf32>
    %200 = arith.addf %199, %22 : vector<8x32xf32>
    %cst_67 = arith.constant dense<0.000000e+00> : vector<8xf32>
    %201 = vector.multi_reduction <add>, %200, %cst_67 [1] : vector<8x32xf32> to vector<8xf32>
    %202 = vector.shape_cast %201 : vector<8xf32> to vector<8x1xf32>
    %cst_68 = arith.constant 3.200000e+01 : f32
    %203 = vector.broadcast %cst_68 : f32 to vector<8x1xf32>
    %204 = arith.divf %202, %203 : vector<8x1xf32>
    %205 = vector.broadcast %204 : vector<8x1xf32> to vector<8x32xf32>
    %206 = arith.subf %200, %205 : vector<8x32xf32>
    %207 = arith.mulf %206, %206 : vector<8x32xf32>
    %cst_69 = arith.constant dense<0.000000e+00> : vector<8xf32>
    %208 = vector.multi_reduction <add>, %207, %cst_69 [1] : vector<8x32xf32> to vector<8xf32>
    %209 = vector.shape_cast %208 : vector<8xf32> to vector<8x1xf32>
    %cst_70 = arith.constant 3.200000e+01 : f32
    %210 = vector.broadcast %cst_70 : f32 to vector<8x1xf32>
    %211 = arith.divf %209, %210 : vector<8x1xf32>
    %212 = vector.broadcast %204 : vector<8x1xf32> to vector<8x32xf32>
    %213 = arith.subf %200, %212 : vector<8x32xf32>
    %cst_71 = arith.constant 9.99999974E-6 : f32
    %214 = vector.broadcast %cst_71 : f32 to vector<8x1xf32>
    %215 = arith.addf %211, %214 : vector<8x1xf32>
    %216 = math.rsqrt %215 : vector<8x1xf32>
    %217 = vector.broadcast %216 : vector<8x1xf32> to vector<8x32xf32>
    %218 = arith.mulf %213, %217 : vector<8x32xf32>
    %219 = vector.broadcast %7 : vector<1x32xf32> to vector<8x32xf32>
    %220 = arith.mulf %218, %219 : vector<8x32xf32>
    %221 = vector.broadcast %8 : vector<1x32xf32> to vector<8x32xf32>
    %222 = arith.addf %220, %221 : vector<8x32xf32>
    %cst_72 = arith.constant dense<0.000000e+00> : vector<8x64xf32>
    %223 = tpu.matmul %222, %18, %cst_72 {dimension_numbers = #tpu.dot_dimension_numbers<[1], [0], [0], [1], [0, 0, 1, 1], [], []>} : vector<8x32xf32>, vector<32x64xf32>, vector<8x64xf32> -> vector<8x64xf32>
    %224 = vector.broadcast %10 : vector<1x64xf32> to vector<8x64xf32>
    %225 = arith.addf %223, %224 : vector<8x64xf32>
    %cst_73 = arith.constant 5.000000e-01 : f32
    %226 = vector.broadcast %cst_73 : f32 to vector<8x64xf32>
    %227 = arith.mulf %226, %225 : vector<8x64xf32>
    %cst_74 = arith.constant 4.471500e-02 : f32
    %228 = vector.broadcast %cst_74 : f32 to vector<8x64xf32>
    %229 = arith.mulf %228, %225 : vector<8x64xf32>
    %230 = arith.mulf %229, %225 : vector<8x64xf32>
    %231 = arith.mulf %230, %225 : vector<8x64xf32>
    %232 = arith.addf %225, %231 : vector<8x64xf32>
    %cst_75 = arith.constant 0.797884583 : f32
    %233 = vector.broadcast %cst_75 : f32 to vector<8x64xf32>
    %234 = arith.mulf %233, %232 : vector<8x64xf32>
    %235 = math.tanh %234 : vector<8x64xf32>
    %cst_76 = arith.constant 1.000000e+00 : f32
    %236 = vector.broadcast %cst_76 : f32 to vector<8x64xf32>
    %237 = arith.addf %236, %235 : vector<8x64xf32>
    %238 = arith.mulf %227, %237 : vector<8x64xf32>
    %cst_77 = arith.constant dense<0.000000e+00> : vector<8x32xf32>
    %239 = tpu.matmul %238, %19, %cst_77 {dimension_numbers = #tpu.dot_dimension_numbers<[1], [0], [0], [1], [0, 0, 1, 1], [], []>} : vector<8x64xf32>, vector<64x32xf32>, vector<8x32xf32> -> vector<8x32xf32>
    %240 = vector.broadcast %9 : vector<1x32xf32> to vector<8x32xf32>
    %241 = arith.addf %239, %240 : vector<8x32xf32>
    %242 = arith.addf %241, %200 : vector<8x32xf32>
    %c0_78 = arith.constant 0 : index
    %c0_79 = arith.constant 0 : index
    %c0_80 = arith.constant 0 : index
    %243 = vector.load %arg8[%c0_78, %c0_79, %c0_80] : memref<2x8x32xf32, #tpu.memory_space<vmem>>, vector<1x8x32xf32>
    %244 = vector.shape_cast %243 : vector<1x8x32xf32> to vector<8x32xf32>
    %245 = vector.shape_cast %242 : vector<8x32xf32> to vector<1x8x32xf32>
    tpu.vector_store %arg8[%c0_78, %c0_79, %c0_80], %245 {strides = array<i32>} : memref<2x8x32xf32, #tpu.memory_space<vmem>>, vector<1x8x32xf32>,
    %c1_81 = arith.constant 1 : index
    %c0_82 = arith.constant 0 : index
    %c0_83 = arith.constant 0 : index
    %246 = vector.load %arg1[%c1_81, %c0_82, %c0_83] : memref<2x8x32xf32, #tpu.memory_space<vmem>>, vector<1x8x32xf32>
    %247 = vector.shape_cast %246 : vector<1x8x32xf32> to vector<8x32xf32>
    %cst_84 = arith.constant dense<0.000000e+00> : vector<8xf32>
    %248 = vector.multi_reduction <add>, %247, %cst_84 [1] : vector<8x32xf32> to vector<8xf32>
    %249 = vector.shape_cast %248 : vector<8xf32> to vector<8x1xf32>
    %cst_85 = arith.constant 3.200000e+01 : f32
    %250 = vector.broadcast %cst_85 : f32 to vector<8x1xf32>
    %251 = arith.divf %249, %250 : vector<8x1xf32>
    %252 = vector.broadcast %251 : vector<8x1xf32> to vector<8x32xf32>
    %253 = arith.subf %247, %252 : vector<8x32xf32>
    %254 = arith.mulf %253, %253 : vector<8x32xf32>
    %cst_86 = arith.constant dense<0.000000e+00> : vector<8xf32>
    %255 = vector.multi_reduction <add>, %254, %cst_86 [1] : vector<8x32xf32> to vector<8xf32>
    %256 = vector.shape_cast %255 : vector<8xf32> to vector<8x1xf32>
    %cst_87 = arith.constant 3.200000e+01 : f32
    %257 = vector.broadcast %cst_87 : f32 to vector<8x1xf32>
    %258 = arith.divf %256, %257 : vector<8x1xf32>
    %259 = vector.broadcast %251 : vector<8x1xf32> to vector<8x32xf32>
    %260 = arith.subf %247, %259 : vector<8x32xf32>
    %cst_88 = arith.constant 9.99999974E-6 : f32
    %261 = vector.broadcast %cst_88 : f32 to vector<8x1xf32>
    %262 = arith.addf %258, %261 : vector<8x1xf32>
    %263 = math.rsqrt %262 : vector<8x1xf32>
    %264 = vector.broadcast %263 : vector<8x1xf32> to vector<8x32xf32>
    %265 = arith.mulf %260, %264 : vector<8x32xf32>
    %266 = vector.broadcast %1 : vector<1x32xf32> to vector<8x32xf32>
    %267 = arith.mulf %265, %266 : vector<8x32xf32>
    %268 = vector.broadcast %2 : vector<1x32xf32> to vector<8x32xf32>
    %269 = arith.addf %267, %268 : vector<8x32xf32>
    %cst_89 = arith.constant dense<0.000000e+00> : vector<8x32xf32>
    %270 = tpu.matmul %269, %12, %cst_89 {dimension_numbers = #tpu.dot_dimension_numbers<[1], [0], [0], [1], [0, 0, 1, 1], [], []>} : vector<8x32xf32>, vector<32x32xf32>, vector<8x32xf32> -> vector<8x32xf32>
    %271 = vector.broadcast %3 : vector<1x32xf32> to vector<8x32xf32>
    %272 = arith.addf %270, %271 : vector<8x32xf32>
    %cst_90 = arith.constant dense<0.000000e+00> : vector<8x32xf32>
    %273 = tpu.matmul %269, %14, %cst_90 {dimension_numbers = #tpu.dot_dimension_numbers<[1], [0], [0], [1], [0, 0, 1, 1], [], []>} : vector<8x32xf32>, vector<32x32xf32>, vector<8x32xf32> -> vector<8x32xf32>
    %274 = vector.broadcast %4 : vector<1x32xf32> to vector<8x32xf32>
    %275 = arith.addf %273, %274 : vector<8x32xf32>
    %cst_91 = arith.constant dense<0.000000e+00> : vector<8x32xf32>
    %276 = tpu.matmul %269, %16, %cst_91 {dimension_numbers = #tpu.dot_dimension_numbers<[1], [0], [0], [1], [0, 0, 1, 1], [], []>} : vector<8x32xf32>, vector<32x32xf32>, vector<8x32xf32> -> vector<8x32xf32>
    %277 = vector.broadcast %5 : vector<1x32xf32> to vector<8x32xf32>
    %278 = arith.addf %276, %277 : vector<8x32xf32>
    %cst_92 = arith.constant 0.000000e+00 : f32
    %279 = vector.broadcast %cst_92 : f32 to vector<32x8xf32>
    %280 = vector.extract_strided_slice %20 {offsets = [0, 0, 0], sizes = [1, 32, 8], strides = [1, 1, 1]} : vector<4x32x8xf32> to vector<1x32x8xf32>
    %281 = vector.shape_cast %280 : vector<1x32x8xf32> to vector<32x8xf32>
    %282 = vector.extract_strided_slice %272 {offsets = [0, 0], sizes = [8, 8], strides = [1, 1]} : vector<8x32xf32> to vector<8x8xf32>
    %cst_93 = arith.constant dense<0.000000e+00> : vector<32x8xf32>
    %283 = tpu.matmul %281, %282, %cst_93 {dimension_numbers = #tpu.dot_dimension_numbers<[1], [0], [0], [1], [0, 0, 1, 1], [], []>} : vector<32x8xf32>, vector<8x8xf32>, vector<32x8xf32> -> vector<32x8xf32>
    %284 = arith.addf %279, %283 : vector<32x8xf32>
    %285 = vector.extract_strided_slice %20 {offsets = [1, 0, 0], sizes = [1, 32, 8], strides = [1, 1, 1]} : vector<4x32x8xf32> to vector<1x32x8xf32>
    %286 = vector.shape_cast %285 : vector<1x32x8xf32> to vector<32x8xf32>
    %287 = vector.extract_strided_slice %272 {offsets = [0, 8], sizes = [8, 8], strides = [1, 1]} : vector<8x32xf32> to vector<8x8xf32>
    %cst_94 = arith.constant dense<0.000000e+00> : vector<32x8xf32>
    %288 = tpu.matmul %286, %287, %cst_94 {dimension_numbers = #tpu.dot_dimension_numbers<[1], [0], [0], [1], [0, 0, 1, 1], [], []>} : vector<32x8xf32>, vector<8x8xf32>, vector<32x8xf32> -> vector<32x8xf32>
    %289 = arith.addf %284, %288 : vector<32x8xf32>
    %290 = vector.extract_strided_slice %20 {offsets = [2, 0, 0], sizes = [1, 32, 8], strides = [1, 1, 1]} : vector<4x32x8xf32> to vector<1x32x8xf32>
    %291 = vector.shape_cast %290 : vector<1x32x8xf32> to vector<32x8xf32>
    %292 = vector.extract_strided_slice %272 {offsets = [0, 16], sizes = [8, 8], strides = [1, 1]} : vector<8x32xf32> to vector<8x8xf32>
    %cst_95 = arith.constant dense<0.000000e+00> : vector<32x8xf32>
    %293 = tpu.matmul %291, %292, %cst_95 {dimension_numbers = #tpu.dot_dimension_numbers<[1], [0], [0], [1], [0, 0, 1, 1], [], []>} : vector<32x8xf32>, vector<8x8xf32>, vector<32x8xf32> -> vector<32x8xf32>
    %294 = arith.addf %289, %293 : vector<32x8xf32>
    %295 = vector.extract_strided_slice %20 {offsets = [3, 0, 0], sizes = [1, 32, 8], strides = [1, 1, 1]} : vector<4x32x8xf32> to vector<1x32x8xf32>
    %296 = vector.shape_cast %295 : vector<1x32x8xf32> to vector<32x8xf32>
    %297 = vector.extract_strided_slice %272 {offsets = [0, 24], sizes = [8, 8], strides = [1, 1]} : vector<8x32xf32> to vector<8x8xf32>
    %cst_96 = arith.constant dense<0.000000e+00> : vector<32x8xf32>
    %298 = tpu.matmul %296, %297, %cst_96 {dimension_numbers = #tpu.dot_dimension_numbers<[1], [0], [0], [1], [0, 0, 1, 1], [], []>} : vector<32x8xf32>, vector<8x8xf32>, vector<32x8xf32> -> vector<32x8xf32>
    %299 = arith.addf %294, %298 : vector<32x8xf32>
    %cst_97 = arith.constant 0.000000e+00 : f32
    %300 = vector.broadcast %cst_97 : f32 to vector<32x8xf32>
    %301 = vector.extract_strided_slice %20 {offsets = [0, 0, 0], sizes = [1, 32, 8], strides = [1, 1, 1]} : vector<4x32x8xf32> to vector<1x32x8xf32>
    %302 = vector.shape_cast %301 : vector<1x32x8xf32> to vector<32x8xf32>
    %303 = vector.extract_strided_slice %275 {offsets = [0, 0], sizes = [8, 8], strides = [1, 1]} : vector<8x32xf32> to vector<8x8xf32>
    %cst_98 = arith.constant dense<0.000000e+00> : vector<32x8xf32>
    %304 = tpu.matmul %302, %303, %cst_98 {dimension_numbers = #tpu.dot_dimension_numbers<[1], [0], [0], [1], [0, 0, 1, 1], [], []>} : vector<32x8xf32>, vector<8x8xf32>, vector<32x8xf32> -> vector<32x8xf32>
    %305 = arith.addf %300, %304 : vector<32x8xf32>
    %306 = vector.extract_strided_slice %20 {offsets = [1, 0, 0], sizes = [1, 32, 8], strides = [1, 1, 1]} : vector<4x32x8xf32> to vector<1x32x8xf32>
    %307 = vector.shape_cast %306 : vector<1x32x8xf32> to vector<32x8xf32>
    %308 = vector.extract_strided_slice %275 {offsets = [0, 8], sizes = [8, 8], strides = [1, 1]} : vector<8x32xf32> to vector<8x8xf32>
    %cst_99 = arith.constant dense<0.000000e+00> : vector<32x8xf32>
    %309 = tpu.matmul %307, %308, %cst_99 {dimension_numbers = #tpu.dot_dimension_numbers<[1], [0], [0], [1], [0, 0, 1, 1], [], []>} : vector<32x8xf32>, vector<8x8xf32>, vector<32x8xf32> -> vector<32x8xf32>
    %310 = arith.addf %305, %309 : vector<32x8xf32>
    %311 = vector.extract_strided_slice %20 {offsets = [2, 0, 0], sizes = [1, 32, 8], strides = [1, 1, 1]} : vector<4x32x8xf32> to vector<1x32x8xf32>
    %312 = vector.shape_cast %311 : vector<1x32x8xf32> to vector<32x8xf32>
    %313 = vector.extract_strided_slice %275 {offsets = [0, 16], sizes = [8, 8], strides = [1, 1]} : vector<8x32xf32> to vector<8x8xf32>
    %cst_100 = arith.constant dense<0.000000e+00> : vector<32x8xf32>
    %314 = tpu.matmul %312, %313, %cst_100 {dimension_numbers = #tpu.dot_dimension_numbers<[1], [0], [0], [1], [0, 0, 1, 1], [], []>} : vector<32x8xf32>, vector<8x8xf32>, vector<32x8xf32> -> vector<32x8xf32>
    %315 = arith.addf %310, %314 : vector<32x8xf32>
    %316 = vector.extract_strided_slice %20 {offsets = [3, 0, 0], sizes = [1, 32, 8], strides = [1, 1, 1]} : vector<4x32x8xf32> to vector<1x32x8xf32>
    %317 = vector.shape_cast %316 : vector<1x32x8xf32> to vector<32x8xf32>
    %318 = vector.extract_strided_slice %275 {offsets = [0, 24], sizes = [8, 8], strides = [1, 1]} : vector<8x32xf32> to vector<8x8xf32>
    %cst_101 = arith.constant dense<0.000000e+00> : vector<32x8xf32>
    %319 = tpu.matmul %317, %318, %cst_101 {dimension_numbers = #tpu.dot_dimension_numbers<[1], [0], [0], [1], [0, 0, 1, 1], [], []>} : vector<32x8xf32>, vector<8x8xf32>, vector<32x8xf32> -> vector<32x8xf32>
    %320 = arith.addf %315, %319 : vector<32x8xf32>
    %cst_102 = arith.constant 0.000000e+00 : f32
    %321 = vector.broadcast %cst_102 : f32 to vector<32x8xf32>
    %322 = vector.extract_strided_slice %20 {offsets = [0, 0, 0], sizes = [1, 32, 8], strides = [1, 1, 1]} : vector<4x32x8xf32> to vector<1x32x8xf32>
    %323 = vector.shape_cast %322 : vector<1x32x8xf32> to vector<32x8xf32>
    %324 = vector.extract_strided_slice %278 {offsets = [0, 0], sizes = [8, 8], strides = [1, 1]} : vector<8x32xf32> to vector<8x8xf32>
    %cst_103 = arith.constant dense<0.000000e+00> : vector<32x8xf32>
    %325 = tpu.matmul %323, %324, %cst_103 {dimension_numbers = #tpu.dot_dimension_numbers<[1], [0], [0], [1], [0, 0, 1, 1], [], []>} : vector<32x8xf32>, vector<8x8xf32>, vector<32x8xf32> -> vector<32x8xf32>
    %326 = arith.addf %321, %325 : vector<32x8xf32>
    %327 = vector.extract_strided_slice %20 {offsets = [1, 0, 0], sizes = [1, 32, 8], strides = [1, 1, 1]} : vector<4x32x8xf32> to vector<1x32x8xf32>
    %328 = vector.shape_cast %327 : vector<1x32x8xf32> to vector<32x8xf32>
    %329 = vector.extract_strided_slice %278 {offsets = [0, 8], sizes = [8, 8], strides = [1, 1]} : vector<8x32xf32> to vector<8x8xf32>
    %cst_104 = arith.constant dense<0.000000e+00> : vector<32x8xf32>
    %330 = tpu.matmul %328, %329, %cst_104 {dimension_numbers = #tpu.dot_dimension_numbers<[1], [0], [0], [1], [0, 0, 1, 1], [], []>} : vector<32x8xf32>, vector<8x8xf32>, vector<32x8xf32> -> vector<32x8xf32>
    %331 = arith.addf %326, %330 : vector<32x8xf32>
    %332 = vector.extract_strided_slice %20 {offsets = [2, 0, 0], sizes = [1, 32, 8], strides = [1, 1, 1]} : vector<4x32x8xf32> to vector<1x32x8xf32>
    %333 = vector.shape_cast %332 : vector<1x32x8xf32> to vector<32x8xf32>
    %334 = vector.extract_strided_slice %278 {offsets = [0, 16], sizes = [8, 8], strides = [1, 1]} : vector<8x32xf32> to vector<8x8xf32>
    %cst_105 = arith.constant dense<0.000000e+00> : vector<32x8xf32>
    %335 = tpu.matmul %333, %334, %cst_105 {dimension_numbers = #tpu.dot_dimension_numbers<[1], [0], [0], [1], [0, 0, 1, 1], [], []>} : vector<32x8xf32>, vector<8x8xf32>, vector<32x8xf32> -> vector<32x8xf32>
    %336 = arith.addf %331, %335 : vector<32x8xf32>
    %337 = vector.extract_strided_slice %20 {offsets = [3, 0, 0], sizes = [1, 32, 8], strides = [1, 1, 1]} : vector<4x32x8xf32> to vector<1x32x8xf32>
    %338 = vector.shape_cast %337 : vector<1x32x8xf32> to vector<32x8xf32>
    %339 = vector.extract_strided_slice %278 {offsets = [0, 24], sizes = [8, 8], strides = [1, 1]} : vector<8x32xf32> to vector<8x8xf32>
    %cst_106 = arith.constant dense<0.000000e+00> : vector<32x8xf32>
    %340 = tpu.matmul %338, %339, %cst_106 {dimension_numbers = #tpu.dot_dimension_numbers<[1], [0], [0], [1], [0, 0, 1, 1], [], []>} : vector<32x8xf32>, vector<8x8xf32>, vector<32x8xf32> -> vector<32x8xf32>
    %341 = arith.addf %336, %340 : vector<32x8xf32>
    %cst_107 = arith.constant 0.000000e+00 : f32
    %342 = vector.broadcast %cst_107 : f32 to vector<8x32xf32>
    %343 = vector.extract_strided_slice %299 {offsets = [0, 0], sizes = [8, 8], strides = [1, 1]} : vector<32x8xf32> to vector<8x8xf32>
    %344 = vector.extract_strided_slice %320 {offsets = [0, 0], sizes = [8, 8], strides = [1, 1]} : vector<32x8xf32> to vector<8x8xf32>
    %345 = vector.extract_strided_slice %341 {offsets = [0, 0], sizes = [8, 8], strides = [1, 1]} : vector<32x8xf32> to vector<8x8xf32>
    "tpu.trace_start"() <{level = 10 : i32, message = "td,sd->ts"}> : () -> ()
    %cst_108 = arith.constant dense<0.000000e+00> : vector<8x8xf32>
    %346 = tpu.matmul %343, %344, %cst_108 {dimension_numbers = #tpu.dot_dimension_numbers<[1], [1], [0], [0], [0, 0, 1, 0], [], []>} : vector<8x8xf32>, vector<8x8xf32>, vector<8x8xf32> -> vector<8x8xf32>
    "tpu.trace_stop"() : () -> ()
    %cst_109 = arith.constant 0.353553385 : f32
    %347 = vector.broadcast %cst_109 : f32 to vector<8x8xf32>
    %348 = arith.mulf %346, %347 : vector<8x8xf32>
    %cst_110 = arith.constant dense<0xFF800000> : vector<8xf32>
    %349 = vector.multi_reduction <maximumf>, %348, %cst_110 [1] : vector<8x8xf32> to vector<8xf32>
    %350 = vector.shape_cast %349 : vector<8xf32> to vector<8x1xf32>
    %351 = vector.broadcast %350 : vector<8x1xf32> to vector<8x8xf32>
    %352 = arith.subf %348, %351 : vector<8x8xf32>
    %353 = math.exp %352 : vector<8x8xf32>
    %cst_111 = arith.constant dense<0.000000e+00> : vector<8xf32>
    %354 = vector.multi_reduction <add>, %353, %cst_111 [1] : vector<8x8xf32> to vector<8xf32>
    %355 = vector.shape_cast %354 : vector<8xf32> to vector<8x1xf32>
    %356 = tpu.reciprocal %355 : vector<8x1xf32> -> vector<8x1xf32>
    %357 = vector.broadcast %356 : vector<8x1xf32> to vector<8x8xf32>
    %358 = arith.mulf %353, %357 : vector<8x8xf32>
    %cst_112 = arith.constant dense<0.000000e+00> : vector<8x8xf32>
    %359 = tpu.matmul %358, %345, %cst_112 {dimension_numbers = #tpu.dot_dimension_numbers<[1], [0], [0], [1], [0, 0, 1, 1], [], []>} : vector<8x8xf32>, vector<8x8xf32>, vector<8x8xf32> -> vector<8x8xf32>
    %360 = vector.extract_strided_slice %17 {offsets = [0, 0], sizes = [8, 32], strides = [1, 1]} : vector<32x32xf32> to vector<8x32xf32>
    %cst_113 = arith.constant dense<0.000000e+00> : vector<8x32xf32>
    %361 = tpu.matmul %359, %360, %cst_113 {dimension_numbers = #tpu.dot_dimension_numbers<[1], [0], [0], [1], [0, 0, 1, 1], [], []>} : vector<8x8xf32>, vector<8x32xf32>, vector<8x32xf32> -> vector<8x32xf32>
    %362 = arith.addf %342, %361 : vector<8x32xf32>
    %363 = vector.extract_strided_slice %299 {offsets = [8, 0], sizes = [8, 8], strides = [1, 1]} : vector<32x8xf32> to vector<8x8xf32>
    %364 = vector.extract_strided_slice %320 {offsets = [8, 0], sizes = [8, 8], strides = [1, 1]} : vector<32x8xf32> to vector<8x8xf32>
    %365 = vector.extract_strided_slice %341 {offsets = [8, 0], sizes = [8, 8], strides = [1, 1]} : vector<32x8xf32> to vector<8x8xf32>
    "tpu.trace_start"() <{level = 10 : i32, message = "td,sd->ts"}> : () -> ()
    %cst_114 = arith.constant dense<0.000000e+00> : vector<8x8xf32>
    %366 = tpu.matmul %363, %364, %cst_114 {dimension_numbers = #tpu.dot_dimension_numbers<[1], [1], [0], [0], [0, 0, 1, 0], [], []>} : vector<8x8xf32>, vector<8x8xf32>, vector<8x8xf32> -> vector<8x8xf32>
    "tpu.trace_stop"() : () -> ()
    %cst_115 = arith.constant 0.353553385 : f32
    %367 = vector.broadcast %cst_115 : f32 to vector<8x8xf32>
    %368 = arith.mulf %366, %367 : vector<8x8xf32>
    %cst_116 = arith.constant dense<0xFF800000> : vector<8xf32>
    %369 = vector.multi_reduction <maximumf>, %368, %cst_116 [1] : vector<8x8xf32> to vector<8xf32>
    %370 = vector.shape_cast %369 : vector<8xf32> to vector<8x1xf32>
    %371 = vector.broadcast %370 : vector<8x1xf32> to vector<8x8xf32>
    %372 = arith.subf %368, %371 : vector<8x8xf32>
    %373 = math.exp %372 : vector<8x8xf32>
    %cst_117 = arith.constant dense<0.000000e+00> : vector<8xf32>
    %374 = vector.multi_reduction <add>, %373, %cst_117 [1] : vector<8x8xf32> to vector<8xf32>
    %375 = vector.shape_cast %374 : vector<8xf32> to vector<8x1xf32>
    %376 = tpu.reciprocal %375 : vector<8x1xf32> -> vector<8x1xf32>
    %377 = vector.broadcast %376 : vector<8x1xf32> to vector<8x8xf32>
    %378 = arith.mulf %373, %377 : vector<8x8xf32>
    %cst_118 = arith.constant dense<0.000000e+00> : vector<8x8xf32>
    %379 = tpu.matmul %378, %365, %cst_118 {dimension_numbers = #tpu.dot_dimension_numbers<[1], [0], [0], [1], [0, 0, 1, 1], [], []>} : vector<8x8xf32>, vector<8x8xf32>, vector<8x8xf32> -> vector<8x8xf32>
    %380 = vector.extract_strided_slice %17 {offsets = [8, 0], sizes = [8, 32], strides = [1, 1]} : vector<32x32xf32> to vector<8x32xf32>
    %cst_119 = arith.constant dense<0.000000e+00> : vector<8x32xf32>
    %381 = tpu.matmul %379, %380, %cst_119 {dimension_numbers = #tpu.dot_dimension_numbers<[1], [0], [0], [1], [0, 0, 1, 1], [], []>} : vector<8x8xf32>, vector<8x32xf32>, vector<8x32xf32> -> vector<8x32xf32>
    %382 = arith.addf %362, %381 : vector<8x32xf32>
    %383 = vector.extract_strided_slice %299 {offsets = [16, 0], sizes = [8, 8], strides = [1, 1]} : vector<32x8xf32> to vector<8x8xf32>
    %384 = vector.extract_strided_slice %320 {offsets = [16, 0], sizes = [8, 8], strides = [1, 1]} : vector<32x8xf32> to vector<8x8xf32>
    %385 = vector.extract_strided_slice %341 {offsets = [16, 0], sizes = [8, 8], strides = [1, 1]} : vector<32x8xf32> to vector<8x8xf32>
    "tpu.trace_start"() <{level = 10 : i32, message = "td,sd->ts"}> : () -> ()
    %cst_120 = arith.constant dense<0.000000e+00> : vector<8x8xf32>
    %386 = tpu.matmul %383, %384, %cst_120 {dimension_numbers = #tpu.dot_dimension_numbers<[1], [1], [0], [0], [0, 0, 1, 0], [], []>} : vector<8x8xf32>, vector<8x8xf32>, vector<8x8xf32> -> vector<8x8xf32>
    "tpu.trace_stop"() : () -> ()
    %cst_121 = arith.constant 0.353553385 : f32
    %387 = vector.broadcast %cst_121 : f32 to vector<8x8xf32>
    %388 = arith.mulf %386, %387 : vector<8x8xf32>
    %cst_122 = arith.constant dense<0xFF800000> : vector<8xf32>
    %389 = vector.multi_reduction <maximumf>, %388, %cst_122 [1] : vector<8x8xf32> to vector<8xf32>
    %390 = vector.shape_cast %389 : vector<8xf32> to vector<8x1xf32>
    %391 = vector.broadcast %390 : vector<8x1xf32> to vector<8x8xf32>
    %392 = arith.subf %388, %391 : vector<8x8xf32>
    %393 = math.exp %392 : vector<8x8xf32>
    %cst_123 = arith.constant dense<0.000000e+00> : vector<8xf32>
    %394 = vector.multi_reduction <add>, %393, %cst_123 [1] : vector<8x8xf32> to vector<8xf32>
    %395 = vector.shape_cast %394 : vector<8xf32> to vector<8x1xf32>
    %396 = tpu.reciprocal %395 : vector<8x1xf32> -> vector<8x1xf32>
    %397 = vector.broadcast %396 : vector<8x1xf32> to vector<8x8xf32>
    %398 = arith.mulf %393, %397 : vector<8x8xf32>
    %cst_124 = arith.constant dense<0.000000e+00> : vector<8x8xf32>
    %399 = tpu.matmul %398, %385, %cst_124 {dimension_numbers = #tpu.dot_dimension_numbers<[1], [0], [0], [1], [0, 0, 1, 1], [], []>} : vector<8x8xf32>, vector<8x8xf32>, vector<8x8xf32> -> vector<8x8xf32>
    %400 = vector.extract_strided_slice %17 {offsets = [16, 0], sizes = [8, 32], strides = [1, 1]} : vector<32x32xf32> to vector<8x32xf32>
    %cst_125 = arith.constant dense<0.000000e+00> : vector<8x32xf32>
    %401 = tpu.matmul %399, %400, %cst_125 {dimension_numbers = #tpu.dot_dimension_numbers<[1], [0], [0], [1], [0, 0, 1, 1], [], []>} : vector<8x8xf32>, vector<8x32xf32>, vector<8x32xf32> -> vector<8x32xf32>
    %402 = arith.addf %382, %401 : vector<8x32xf32>
    %403 = vector.extract_strided_slice %299 {offsets = [24, 0], sizes = [8, 8], strides = [1, 1]} : vector<32x8xf32> to vector<8x8xf32>
    %404 = vector.extract_strided_slice %320 {offsets = [24, 0], sizes = [8, 8], strides = [1, 1]} : vector<32x8xf32> to vector<8x8xf32>
    %405 = vector.extract_strided_slice %341 {offsets = [24, 0], sizes = [8, 8], strides = [1, 1]} : vector<32x8xf32> to vector<8x8xf32>
    "tpu.trace_start"() <{level = 10 : i32, message = "td,sd->ts"}> : () -> ()
    %cst_126 = arith.constant dense<0.000000e+00> : vector<8x8xf32>
    %406 = tpu.matmul %403, %404, %cst_126 {dimension_numbers = #tpu.dot_dimension_numbers<[1], [1], [0], [0], [0, 0, 1, 0], [], []>} : vector<8x8xf32>, vector<8x8xf32>, vector<8x8xf32> -> vector<8x8xf32>
    "tpu.trace_stop"() : () -> ()
    %cst_127 = arith.constant 0.353553385 : f32
    %407 = vector.broadcast %cst_127 : f32 to vector<8x8xf32>
    %408 = arith.mulf %406, %407 : vector<8x8xf32>
    %cst_128 = arith.constant dense<0xFF800000> : vector<8xf32>
    %409 = vector.multi_reduction <maximumf>, %408, %cst_128 [1] : vector<8x8xf32> to vector<8xf32>
    %410 = vector.shape_cast %409 : vector<8xf32> to vector<8x1xf32>
    %411 = vector.broadcast %410 : vector<8x1xf32> to vector<8x8xf32>
    %412 = arith.subf %408, %411 : vector<8x8xf32>
    %413 = math.exp %412 : vector<8x8xf32>
    %cst_129 = arith.constant dense<0.000000e+00> : vector<8xf32>
    %414 = vector.multi_reduction <add>, %413, %cst_129 [1] : vector<8x8xf32> to vector<8xf32>
    %415 = vector.shape_cast %414 : vector<8xf32> to vector<8x1xf32>
    %416 = tpu.reciprocal %415 : vector<8x1xf32> -> vector<8x1xf32>
    %417 = vector.broadcast %416 : vector<8x1xf32> to vector<8x8xf32>
    %418 = arith.mulf %413, %417 : vector<8x8xf32>
    %cst_130 = arith.constant dense<0.000000e+00> : vector<8x8xf32>
    %419 = tpu.matmul %418, %405, %cst_130 {dimension_numbers = #tpu.dot_dimension_numbers<[1], [0], [0], [1], [0, 0, 1, 1], [], []>} : vector<8x8xf32>, vector<8x8xf32>, vector<8x8xf32> -> vector<8x8xf32>
    %420 = vector.extract_strided_slice %17 {offsets = [24, 0], sizes = [8, 32], strides = [1, 1]} : vector<32x32xf32> to vector<8x32xf32>
    %cst_131 = arith.constant dense<0.000000e+00> : vector<8x32xf32>
    %421 = tpu.matmul %419, %420, %cst_131 {dimension_numbers = #tpu.dot_dimension_numbers<[1], [0], [0], [1], [0, 0, 1, 1], [], []>} : vector<8x8xf32>, vector<8x32xf32>, vector<8x32xf32> -> vector<8x32xf32>
    %422 = arith.addf %402, %421 : vector<8x32xf32>
    %423 = vector.broadcast %6 : vector<1x32xf32> to vector<8x32xf32>
    %424 = arith.addf %422, %423 : vector<8x32xf32>
    %425 = arith.addf %424, %247 : vector<8x32xf32>
    %cst_132 = arith.constant dense<0.000000e+00> : vector<8xf32>
    %426 = vector.multi_reduction <add>, %425, %cst_132 [1] : vector<8x32xf32> to vector<8xf32>
    %427 = vector.shape_cast %426 : vector<8xf32> to vector<8x1xf32>
    %cst_133 = arith.constant 3.200000e+01 : f32
    %428 = vector.broadcast %cst_133 : f32 to vector<8x1xf32>
    %429 = arith.divf %427, %428 : vector<8x1xf32>
    %430 = vector.broadcast %429 : vector<8x1xf32> to vector<8x32xf32>
    %431 = arith.subf %425, %430 : vector<8x32xf32>
    %432 = arith.mulf %431, %431 : vector<8x32xf32>
    %cst_134 = arith.constant dense<0.000000e+00> : vector<8xf32>
    %433 = vector.multi_reduction <add>, %432, %cst_134 [1] : vector<8x32xf32> to vector<8xf32>
    %434 = vector.shape_cast %433 : vector<8xf32> to vector<8x1xf32>
    %cst_135 = arith.constant 3.200000e+01 : f32
    %435 = vector.broadcast %cst_135 : f32 to vector<8x1xf32>
    %436 = arith.divf %434, %435 : vector<8x1xf32>
    %437 = vector.broadcast %429 : vector<8x1xf32> to vector<8x32xf32>
    %438 = arith.subf %425, %437 : vector<8x32xf32>
    %cst_136 = arith.constant 9.99999974E-6 : f32
    %439 = vector.broadcast %cst_136 : f32 to vector<8x1xf32>
    %440 = arith.addf %436, %439 : vector<8x1xf32>
    %441 = math.rsqrt %440 : vector<8x1xf32>
    %442 = vector.broadcast %441 : vector<8x1xf32> to vector<8x32xf32>
    %443 = arith.mulf %438, %442 : vector<8x32xf32>
    %444 = vector.broadcast %7 : vector<1x32xf32> to vector<8x32xf32>
    %445 = arith.mulf %443, %444 : vector<8x32xf32>
    %446 = vector.broadcast %8 : vector<1x32xf32> to vector<8x32xf32>
    %447 = arith.addf %445, %446 : vector<8x32xf32>
    %cst_137 = arith.constant dense<0.000000e+00> : vector<8x64xf32>
    %448 = tpu.matmul %447, %18, %cst_137 {dimension_numbers = #tpu.dot_dimension_numbers<[1], [0], [0], [1], [0, 0, 1, 1], [], []>} : vector<8x32xf32>, vector<32x64xf32>, vector<8x64xf32> -> vector<8x64xf32>
    %449 = vector.broadcast %10 : vector<1x64xf32> to vector<8x64xf32>
    %450 = arith.addf %448, %449 : vector<8x64xf32>
    %cst_138 = arith.constant 5.000000e-01 : f32
    %451 = vector.broadcast %cst_138 : f32 to vector<8x64xf32>
    %452 = arith.mulf %451, %450 : vector<8x64xf32>
    %cst_139 = arith.constant 4.471500e-02 : f32
    %453 = vector.broadcast %cst_139 : f32 to vector<8x64xf32>
    %454 = arith.mulf %453, %450 : vector<8x64xf32>
    %455 = arith.mulf %454, %450 : vector<8x64xf32>
    %456 = arith.mulf %455, %450 : vector<8x64xf32>
    %457 = arith.addf %450, %456 : vector<8x64xf32>
    %cst_140 = arith.constant 0.797884583 : f32
    %458 = vector.broadcast %cst_140 : f32 to vector<8x64xf32>
    %459 = arith.mulf %458, %457 : vector<8x64xf32>
    %460 = math.tanh %459 : vector<8x64xf32>
    %cst_141 = arith.constant 1.000000e+00 : f32
    %461 = vector.broadcast %cst_141 : f32 to vector<8x64xf32>
    %462 = arith.addf %461, %460 : vector<8x64xf32>
    %463 = arith.mulf %452, %462 : vector<8x64xf32>
    %cst_142 = arith.constant dense<0.000000e+00> : vector<8x32xf32>
    %464 = tpu.matmul %463, %19, %cst_142 {dimension_numbers = #tpu.dot_dimension_numbers<[1], [0], [0], [1], [0, 0, 1, 1], [], []>} : vector<8x64xf32>, vector<64x32xf32>, vector<8x32xf32> -> vector<8x32xf32>
    %465 = vector.broadcast %9 : vector<1x32xf32> to vector<8x32xf32>
    %466 = arith.addf %464, %465 : vector<8x32xf32>
    %467 = arith.addf %466, %425 : vector<8x32xf32>
    %c1_143 = arith.constant 1 : index
    %c0_144 = arith.constant 0 : index
    %c0_145 = arith.constant 0 : index
    %468 = vector.load %arg8[%c1_143, %c0_144, %c0_145] : memref<2x8x32xf32, #tpu.memory_space<vmem>>, vector<1x8x32xf32>
    %469 = vector.shape_cast %468 : vector<1x8x32xf32> to vector<8x32xf32>
    %470 = vector.shape_cast %467 : vector<8x32xf32> to vector<1x8x32xf32>
    tpu.vector_store %arg8[%c1_143, %c0_144, %c0_145], %470 {strides = array<i32>} : memref<2x8x32xf32, #tpu.memory_space<vmem>>, vector<1x8x32xf32>,
    return
  }
  func.func @transform_0(%arg0: i32) -> (i32, i32, i32) {
    %c0_i32 = arith.constant 0 : i32
    %c0_i32_0 = arith.constant 0 : i32
    %c0_i32_1 = arith.constant 0 : i32
    %c0_i32_2 = arith.constant 0 : i32
    return %c0_i32, %c0_i32_0, %c0_i32_1 : i32, i32, i32
  }
  func.func @transform_1(%arg0: i32) -> (i32, i32, i32) {
    %c0_i32 = arith.constant 0 : i32
    %c0_i32_0 = arith.constant 0 : i32
    %c0_i32_1 = arith.constant 0 : i32
    %c0_i32_2 = arith.constant 0 : i32
    return %c0_i32, %c0_i32_0, %c0_i32_1 : i32, i32, i32
  }
  func.func @transform_2(%arg0: i32) -> (i32, i32) {
    %c0_i32 = arith.constant 0 : i32
    %c0_i32_0 = arith.constant 0 : i32
    %c0_i32_1 = arith.constant 0 : i32
    return %c0_i32, %c0_i32_0 : i32, i32
  }
  func.func @transform_3(%arg0: i32) -> (i32, i32) {
    %c0_i32 = arith.constant 0 : i32
    %c0_i32_0 = arith.constant 0 : i32
    %c0_i32_1 = arith.constant 0 : i32
    return %c0_i32, %c0_i32_0 : i32, i32
  }
  func.func @transform_4(%arg0: i32) -> (i32, i32) {
    %c0_i32 = arith.constant 0 : i32
    %c0_i32_0 = arith.constant 0 : i32
    %c0_i32_1 = arith.constant 0 : i32
    return %c0_i32, %c0_i32_0 : i32, i32
  }
  func.func @transform_5(%arg0: i32) -> (i32, i32) {
    %c0_i32 = arith.constant 0 : i32
    %c0_i32_0 = arith.constant 0 : i32
    %c0_i32_1 = arith.constant 0 : i32
    return %c0_i32, %c0_i32_0 : i32, i32
  }
  func.func @transform_6(%arg0: i32) -> (i32, i32, i32) {
    %c0_i32 = arith.constant 0 : i32
    %c0_i32_0 = arith.constant 0 : i32
    %c0_i32_1 = arith.constant 0 : i32
    %c0_i32_2 = arith.constant 0 : i32
    return %c0_i32, %c0_i32_0, %c0_i32_1 : i32, i32, i32
  }
  func.func @transform_7(%arg0: i32) -> (i32, i32, i32) {
    %c0_i32 = arith.constant 0 : i32
    %c0_i32_0 = arith.constant 0 : i32
    %c0_i32_1 = arith.constant 0 : i32
    %c0_i32_2 = arith.constant 0 : i32
    return %c0_i32, %c0_i32_0, %c0_i32_1 : i32, i32, i32
  }
}

</mosaic_0001>

<bundles_post_ra>
// kernel: siglip_block.1
= control target key start
LH: loop header
LB: loop body
LE: loop exit
PB: predicated region body
PF: predicated region fallthrough
CT: control target
= control target key end

     0   :  { %vm76_vm0 = vcmask 261120   ;;  %s6844_s0 = inlined_call_operand.vmem [shape: f32[2,8,32], index: 0, kind: input, shape index: {}]   ;;  %s6845_s1 = inlined_call_operand.vmem [shape: f32[3,32,32], index: 1, kind: input, shape index: {}]   ;;  %s6846_s2 = inlined_call_operand.vmem [shape: f32[32,32], index: 2, kind: input, shape index: {}]   ;;  %s6847_s3 = inlined_call_operand.vmem [shape: f32[32,64], index: 3, kind: input, shape index: {}]   ;;  %s6848_s4 = inlined_call_operand.vmem [shape: f32[64,32], index: 4, kind: input, shape index: {}]   ;;  %s6849_s5 = inlined_call_operand.vmem [shape: f32[10,64], index: 5, kind: input, shape index: {}]   ;;  %s6850_s6 = inlined_call_operand.vmem [shape: f32[4,32,8], index: 6, kind: input, shape index: {}]   ;;  %s6851_s7 = inlined_call_operand.hbm [shape: f32[2,8,32], index: 7, kind: output, shape index: {}]  }
   0x1   :  { %v5964_v0 = vld [vmem:[%s6844_s0] sm:$0xff] }
   0x2   :  { %12 = vsyncpa [#allocation3], 0  ;;  %v77_v1 = vsel %vm76_vm0, %v5964_v0, 0.0  ;;  %v5973_v7 = vld [vmem:[%s6845_s1 + $0x18] sm:$0xff]  ;;  %v6854_v9 = vmov 0.0   ;;  %v5985_v10 = vld [vmem:[%s6845_s1 + $0x10] sm:$0xff]  ;;  %v91_v19 = vlaneseq }
   0x3   :  { %78 = vadd.xlane.f32.xlu0 %v77_v1  ;;  %v5978_v8 = vld [vmem:[%s6845_s1 + $0x38] sm:$0xff]  ;;  %5388 = vmatprep.subr.mxu0 %v6854_v9  ;;  %v5990_v11 = vld [vmem:[%s6845_s1 + $0x30] sm:$0xff]  ;;  %v5999_v12 = vld [vmem:[%s6845_s1 + $0x8] sm:$0xff]  ;;  %vm5914_vm1 = vmmov 0   ;;  %vm330_vm2 = vcmask 64512   ;;  %s5916_s10 = smov 120  }
   0x4   :  { %5399 = vmatprep.subr.mxu1 %v6854_v9  ;;  %5389 = vmatpush3.msra.mxu0 %v5973_v7  ;;  %v6004_v13 = vld [vmem:[%s6845_s1 + $0x28] sm:$0xff]  ;;  %v6013_v14 = vld [vmem:[%s6845_s1] sm:$0xff]  ;;  %v6031_v20 = vshrl.u32 %v91_v19, 7  ;;  %v6055_v30 = vld [vmem:[%s6845_s1 + $0x58] sm:$0xff]  ;;  %s5917_s11 = smov 112   ;;  %vm2506_vm3 = vcmask 523264  }
   0x5   :  { %5400 = vmatpush3.msra.mxu1 %v5978_v8  ;;  %5390 = vmatprep.subr.mxu0 %v6854_v9  ;;  %v6020_v15 = vld [vmem:[%s6845_s1 + $0x20] sm:$0xff]  ;;  %v6062_v31 = vld [vmem:[%s6845_s1 + $0x50] sm:$0xff]  ;;  %v6071_v32 = vld [vmem:[%s6845_s1 + $0x48] sm:$0xff] }
   0x6   :  { %5401 = vmatprep.subr.mxu1 %v6854_v9  ;;  %5391 = vmatpush3.msra.mxu0 %v5985_v10  ;;  %v6852_v21 = vsub.s32 0, %v6031_v20  ;;  %v6037_v22 = vld [vmem:[%s6849_s5] sm:$0xff]  ;;  %v6853_v23 = vsub.s32 1, %v6031_v20  ;;  %v6092_v35 = vld [vmem:[%s6850_s6 + $0x30] sm:$0xff]  ;;  %v103_v36 = vsub.s32 2, %v6031_v20  ;;  %v180_v41 = vsub.s32 3, %v6031_v20 }
   0x7   :  { %5402 = vmatpush3.msra.mxu1 %v5990_v11  ;;  %5392 = vmatprep.subr.mxu0 %v6854_v9  ;;  %v6078_v33 = vld [vmem:[%s6845_s1 + $0x40] sm:$0xff]  ;;  %s5915_s1 = smov 104   ;;  %v254_v48 = vsub.s32 4, %v6031_v20  ;;  %v6130_v52 = vld [vmem:[%s6850_s6 + $0x28] sm:$0xff]  ;;  %v6135_v53 = vld [vmem:[%s6850_s6 + $0x38] sm:$0xff] }
   0x8   :  { %5403 = vmatprep.subr.mxu1 %v6854_v9  ;;  %5393 = vmatpush3.msra.mxu0 %v5999_v12  ;;  %v6043_v24 = vrot.slane %v6037_v22, %v6852_v21  ;;  %v6048_v27 = vrot.slane %v6037_v22, %v6853_v23  ;;  %v6087_v34 = vld [vmem:[%s6850_s6 + $0x20] sm:$0xff]  ;;  %v6100_v37 = vrot.slane %v6037_v22, %v103_v36  ;;  %v6156_v57 = vld [vmem:[%s6850_s6 + $0x8] sm:$0xff]  ;;  %v6170_v60 = vld [vmem:[%s6850_s6 + $0x10] sm:$0xff] }
   0x9   :  { %5404 = vmatpush3.msra.mxu1 %v6004_v13  ;;  %5394 = vmatprep.subr.mxu0 %v6854_v9  ;;  %v6107_v44 = vrot.slane %v6037_v22, %v180_v41  ;;  %v6115_v49 = vrot.slane %v6037_v22, %v254_v48  ;;  %6874 = vst [vmem:[#allocation6_spill] sm:$0xff] %v6135_v53  ;;  %v6140_v54 = vld [vmem:[%s6850_s6] sm:$0xff]  ;;  %v6161_v59 = vld [vmem:[%s6850_s6 + $0x48] sm:$0xff]  ;;  %v6175_v61 = vld [vmem:[%s6850_s6 + $0x50] sm:$0xff] }
   0xa   :  { %5405 = vmatprep.subr.mxu1 %v6854_v9  ;;  %5395 = vmatpush3.msra.mxu0 %v6013_v14  ;;  %v6151_v56 = vld [vmem:[%s6850_s6 + $0x40] sm:$0xff]  ;;  %6876 = vst [vmem:[#allocation8_spill] sm:$0xff] %v6161_v59  ;;  %6877 = vst [vmem:[#allocation9_spill] sm:$0xff] %v6175_v61  ;;  %v6182_v63 = vld [vmem:[%s6850_s6 + $0x18] sm:$0xff] }
   0xb   :  { %5396 = vmatprep.mubr.msk.f32.mxu0 %vm5914_vm1, %v6854_v9  ;;  %5406 = vmatpush3.msra.mxu1 %v6020_v15  ;;  %6873 = vst [vmem:[#allocation5_spill] sm:$0xff] %v6115_v49  ;;  %6875 = vst [vmem:[#allocation7_spill] sm:$0xff] %v6151_v56  ;;  %v6187_v1 = vld [vmem:[%s6850_s6 + $0x58] sm:$0xff] }
   0xc   :  { %5407 = vmatprep.mubr.msk.f32.mxu1 %vm5914_vm1, %v6854_v9  ;;  %5410 = vmatprep.subr.mxu0 %v6854_v9  ;;  %6878 = vst [vmem:[#allocation10_spill] sm:$0xff] %v6187_v1 }
  0x8c   :  { %v79_v2 = vpop.xlane.xlu0 %78 }
  0x8d   :  { %v81_v3 = vmul.f32 0.03125, %v79_v2  ;;  %v6192_v2 = vld [vmem:[%s6850_s6 + $0x60] sm:$0xff] }
  0x8f   :  { %v82_v4 = vsub.f32 %v5964_v0, %v81_v3 }
  0x91   :  { %v83_v5 = vmul.f32 %v82_v4, %v82_v4 }
  0x93   :  { %v84_v6 = vsel %vm76_vm0, %v83_v5, 0.0  ;;  %v6216_v5 = vld [vmem:[%s6850_s6 + $0x70] sm:$0xff] }
  0x94   :  { %85 = vadd.xlane.f32.xlu0 %v84_v6  ;;  %6880 = vst [vmem:[#allocation12_spill] sm:$0xff] %v6216_v5 }
 0x11d   :  { %v86_v16 = vpop.xlane.xlu0 %85 }
 0x11e   :  { %v87_v17 = vmul.f32 0.03125, %v86_v16  ;;  %v6223_v16 = vld [vmem:[%s6850_s6 + $0x78] sm:$0xff] }
 0x11f   :  { %6881 = vst [vmem:[#allocation13_spill] sm:$0xff] %v6223_v16 }
 0x120   :  { %v88_v18 = vadd.f32 1e-05, %v87_v17 }
 0x122   :  { %5836 = vrsqrt.f32 %v88_v18 }
 0x12f   :  { %v5837_v25 = vpop.eup %5836 }
 0x130   :  { %v90_v26 = vmul.f32 %v5837_v25, %v82_v4  ;;  %v6207_v4 = vld [vmem:[%s6850_s6 + $0x68] sm:$0xff] }
 0x131   :  { %6879 = vst [vmem:[#allocation11_spill] sm:$0xff] %v6207_v4 }
 0x132   :  { %v95_v28 = vmul.f32 %v6043_v24, %v90_v26 }
 0x134   :  { %v100_v29 = vadd.f32 %v6048_v27, %v95_v28 }
 0x136   :  { %5397 = vmatmul.mubr.msk.f32.vlgmr.msra.gmra.mxu0 %vm76_vm0, %v100_v29  ;;  %5408 = vmatmul.mubr.msk.f32.vlgmr.msra.gmra.mxu1 %vm76_vm0, %v100_v29 }
 0x137   :  { %5411 = vmatpush3.msra.mxu0 %v6055_v30  ;;  %5418 = vmatprep.mubr.msk.f32.mxu0 %vm5914_vm1, %v6854_v9 }
 0x138   :  { %5412 = vmatprep.subr.mxu0 %v6854_v9  ;;  %5426 = vmatprep.mubr.msk.f32.mxu1 %vm330_vm2, %v6092_v35 }
 0x139   :  { %5413 = vmatpush3.msra.mxu0 %v6062_v31 }
 0x13a   :  { %5414 = vmatprep.subr.mxu0 %v6854_v9 }
 0x13b   :  { %5415 = vmatpush3.msra.mxu0 %v6071_v32 }
 0x13c   :  { %5416 = vmatprep.subr.mxu0 %v6854_v9 }
 0x13d   :  { %5417 = vmatpush3.msra.mxu0 %v6078_v33 }
 0x13e   :  { %5419 = vmatmul.mubr.msk.f32.vlgmr.msra.gmra.mxu0 %vm76_vm0, %v100_v29 }
 0x13f   :  { %5423 = vmatprep.mubr.msk.f32.mxu0 %vm330_vm2, %v6087_v34 }
 0x1f6   :  { %v174_v38 = vpop.f32.mrf.mxu0  ;;  %v248_v39 = vpop.f32.mrf.mxu1 }
 0x1f7   :  { %v175_v40 = vadd.f32 %v174_v38, %v6100_v37  ;;  %v249_v46 = vadd.f32 %v248_v39, %v6107_v44 }
 0x1f8   :  { %v5398_v42 = vpop.f32.mrf.mxu0  ;;  %v5409_v43 = vpop.f32.mrf.mxu1 }
 0x1f9   :  { %629 = vrot.lane.b32.xlu0 %v175_v40, %s5915_s1  ;;  %327 = vrot.lane.b32.xlu1 %v175_v40, %s5916_s10 }
 0x1fd   :  { %525 = vrot.lane.b32.xlu1 %v175_v40, %s5917_s11 }
 0x1fe   :  { %v322_v45 = vpop.f32.mrf.mxu0 }
 0x1ff   :  { %v6119_v50 = vadd.f32 %v322_v45, %v6115_v49 }
 0x200   :  { %v5420_v47 = vpop.f32.mrf.mxu0 }
 0x201   :  { %734 = vrot.lane.b32.xlu1 %v249_v46, %s5916_s10 }
 0x205   :  { %907 = vrot.lane.b32.xlu1 %v249_v46, %s5917_s11 }
 0x209   :  { %999 = vrot.lane.b32.xlu1 %v249_v46, %s5915_s1 }
 0x20d   :  { %1092 = vrot.lane.b32.xlu1 %v6119_v50, %s5916_s10 }
 0x211   :  { %1265 = vrot.lane.b32.xlu1 %v6119_v50, %s5917_s11 }
 0x215   :  { %1357 = vrot.lane.b32.xlu1 %v6119_v50, %s5915_s1 }
 0x26b   :  { %v328_v51 = vpop.permute.xlu1 %327  ;;  %v630_v58 = vpop.permute.xlu0 %629 }
 0x26c   :  { %5421 = vmatprep.subr.mxu0 %v328_v51  ;;  %5826 = vmatprep.subr.mxu1 %v328_v51 }
 0x26d   :  { %5422 = vmatpush3.msra.mxu0 %v328_v51  ;;  %5827 = vmatpush3.msra.mxu1 %v328_v51 }
 0x26e   :  { %5424 = vmatmul.mubr.msk.f32.vlgmr.msra.gmra.mxu0 %vm330_vm2, %v6130_v52  ;;  %5427 = vmatmul.mubr.msk.f32.vlgmr.msra.gmra.mxu1 %vm330_vm2, %v6135_v53 }
 0x26f   :  { %5429 = vmatprep.subr.mxu0 %v175_v40  ;;  %v526_v55 = vpop.permute.xlu1 %525  ;;  %5431 = vmatprep.mubr.msk.f32.mxu0 %vm330_vm2, %v6140_v54 }
 0x270   :  { %5430 = vmatpush3.msra.mxu0 %v175_v40  ;;  %5437 = vmatprep.subr.mxu1 %v526_v55 }
 0x271   :  { %5445 = vmatprep.subr.mxu0 %v630_v58  ;;  %5438 = vmatpush3.msra.mxu1 %v526_v55 }
 0x272   :  { %5439 = vmatprep.mubr.msk.f32.mxu1 %vm330_vm2, %v6151_v56  ;;  %5432 = vmatmul.mubr.msk.f32.vlgmr.msra.gmra.mxu0 %vm330_vm2, %v6156_v57 }
 0x273   :  { %5440 = vmatmul.mubr.msk.f32.vlgmr.msra.gmra.mxu1 %vm330_vm2, %v6161_v59  ;;  %5446 = vmatpush3.msra.mxu0 %v630_v58  ;;  %v735_v62 = vpop.permute.xlu1 %734 }
 0x274   :  { %5461 = vmatprep.subr.mxu0 %v249_v46  ;;  %5453 = vmatprep.subr.mxu1 %v735_v62 }
 0x275   :  { %5434 = vmatprep.mubr.msk.f32.mxu0 %vm330_vm2, %v6170_v60  ;;  %5442 = vmatprep.mubr.msk.f32.mxu1 %vm330_vm2, %v6175_v61 }
 0x276   :  { %5454 = vmatpush3.msra.mxu1 %v735_v62  ;;  %5435 = vmatmul.mubr.msk.f32.gmra.mxu0 %vm330_vm2, %v6182_v63 }
 0x277   :  { %5443 = vmatmul.mubr.msk.f32.gmra.mxu1 %vm330_vm2, %v6187_v1  ;;  %v908_v3 = vpop.permute.xlu1 %907  ;;  %5447 = vmatprep.mubr.msk.f32.mxu0 %vm330_vm2, %v6192_v2 }
 0x278   :  { %5469 = vmatprep.subr.mxu1 %v908_v3  ;;  %5455 = vmatprep.mubr.msk.f32.mxu1 %vm330_vm2, %v6087_v34 }
 0x27a   :  { %5448 = vmatmul.mubr.msk.f32.vlgmr.msra.gmra.mxu0 %vm330_vm2, %v6207_v4 }
 0x27b   :  { %5456 = vmatmul.mubr.msk.f32.vlgmr.msra.gmra.mxu1 %vm330_vm2, %v6130_v52  ;;  %5462 = vmatpush3.msra.mxu0 %v249_v46  ;;  %v1000_v6 = vpop.permute.xlu1 %999 }
 0x27c   :  { %5470 = vmatpush3.msra.mxu1 %v908_v3  ;;  %5477 = vmatprep.subr.mxu0 %v1000_v6 }
 0x27d   :  { %5450 = vmatprep.mubr.msk.f32.mxu0 %vm330_vm2, %v6216_v5  ;;  %5458 = vmatprep.mubr.msk.f32.mxu1 %vm330_vm2, %v6092_v35 }
 0x27e   :  { %5451 = vmatmul.mubr.msk.f32.gmra.mxu0 %vm330_vm2, %v6223_v16 }
 0x27f   :  { %5459 = vmatmul.mubr.msk.f32.gmra.mxu1 %vm330_vm2, %v6135_v53  ;;  %v1093_v17 = vpop.permute.xlu1 %1092  ;;  %5463 = vmatprep.mubr.msk.f32.mxu0 %vm330_vm2, %v6140_v54 }
 0x280   :  { %5485 = vmatprep.subr.mxu1 %v1093_v17  ;;  %5471 = vmatprep.mubr.msk.f32.mxu1 %vm330_vm2, %v6151_v56 }
 0x282   :  { %5464 = vmatmul.mubr.msk.f32.vlgmr.msra.gmra.mxu0 %vm330_vm2, %v6156_v57 }
 0x283   :  { %5472 = vmatmul.mubr.msk.f32.vlgmr.msra.gmra.mxu1 %vm330_vm2, %v6161_v59  ;;  %5478 = vmatpush3.msra.mxu0 %v1000_v6  ;;  %v1266_v18 = vpop.permute.xlu1 %1265 }
 0x284   :  { %5486 = vmatpush3.msra.mxu1 %v1093_v17  ;;  %5493 = vmatprep.subr.mxu0 %v6119_v50 }
 0x285   :  { %5501 = vmatprep.subr.mxu1 %v1266_v18  ;;  %5466 = vmatprep.mubr.msk.f32.mxu0 %vm330_vm2, %v6170_v60 }
 0x286   :  { %5474 = vmatprep.mubr.msk.f32.mxu1 %vm330_vm2, %v6175_v61  ;;  %5467 = vmatmul.mubr.msk.f32.gmra.mxu0 %vm330_vm2, %v6182_v63 }
 0x287   :  { %5475 = vmatmul.mubr.msk.f32.gmra.mxu1 %vm330_vm2, %v6187_v1  ;;  %5479 = vmatprep.mubr.msk.f32.mxu0 %vm330_vm2, %v6192_v2  ;;  %v1358_v19 = vpop.permute.xlu1 %1357 }
 0x288   :  { %5487 = vmatprep.mubr.msk.f32.mxu1 %vm330_vm2, %v6087_v34 }
 0x28a   :  { %5480 = vmatmul.mubr.msk.f32.vlgmr.msra.gmra.mxu0 %vm330_vm2, %v6207_v4 }
 0x28b   :  { %5488 = vmatmul.mubr.msk.f32.vlgmr.msra.gmra.mxu1 %vm330_vm2, %v6130_v52  ;;  %5494 = vmatpush3.msra.mxu0 %v6119_v50 }
 0x28c   :  { %5502 = vmatpush3.msra.mxu1 %v1266_v18  ;;  %5509 = vmatprep.subr.mxu0 %v1358_v19 }
 0x28d   :  { %5482 = vmatprep.mubr.msk.f32.mxu0 %vm330_vm2, %v6216_v5  ;;  %5490 = vmatprep.mubr.msk.f32.mxu1 %vm330_vm2, %v6092_v35 }
 0x28e   :  { %5483 = vmatmul.mubr.msk.f32.gmra.mxu0 %vm330_vm2, %v6223_v16  ;;  %5517 = vmatprep.subr.mxu1 %v6854_v9 }
 0x28f   :  { %5495 = vmatprep.mubr.msk.f32.mxu0 %vm330_vm2, %v6140_v54  ;;  %5491 = vmatmul.mubr.msk.f32.gmra.mxu1 %vm330_vm2, %v6135_v53 }
 0x290   :  { %5503 = vmatprep.mubr.msk.f32.mxu1 %vm330_vm2, %v6151_v56 }
 0x292   :  { %5496 = vmatmul.mubr.msk.f32.vlgmr.msra.gmra.mxu0 %vm330_vm2, %v6156_v57 }
 0x293   :  { %5510 = vmatpush3.msra.mxu0 %v1358_v19  ;;  %5498 = vmatprep.mubr.msk.f32.mxu0 %vm330_vm2, %v6170_v60 }
 0x294   :  { %5504 = vmatmul.mubr.msk.f32.vlgmr.msra.gmra.mxu1 %vm330_vm2, %v6161_v59  ;;  %5527 = vmatprep.subr.mxu0 %v6854_v9 }
 0x295   :  { %5506 = vmatprep.mubr.msk.f32.mxu1 %vm330_vm2, %v6175_v61 }
 0x296   :  { %5499 = vmatmul.mubr.msk.f32.gmra.mxu0 %vm330_vm2, %v6182_v63 }
 0x297   :  { %5511 = vmatprep.mubr.msk.f32.mxu0 %vm330_vm2, %v6192_v2 }
 0x298   :  { %5507 = vmatmul.mubr.msk.f32.gmra.mxu1 %vm330_vm2, %v6187_v1 }
 0x299   :  { %5519 = vmatprep.mubr.msk.f32.mxu1 %vm5914_vm1, %v6854_v9 }
 0x29a   :  { %5512 = vmatmul.mubr.msk.f32.vlgmr.msra.gmra.mxu0 %vm330_vm2, %v6207_v4 }
 0x29b   :  { %5514 = vmatprep.mubr.msk.f32.mxu0 %vm330_vm2, %v6216_v5 }
 0x29e   :  { %5515 = vmatmul.mubr.msk.f32.gmra.mxu0 %vm330_vm2, %v6223_v16 }
 0x29f   :  { %5529 = vmatprep.mubr.msk.f32.mxu0 %vm5914_vm1, %v6854_v9 }
 0x32e   :  { %v5425_v25 = vpop.f32.mrf.mxu0  ;;  %v5428_v26 = vpop.f32.mrf.mxu1 }
 0x330   :  { %v409_v28 = vpop.f32.mrf.mxu0  ;;  %v419_v29 = vpop.f32.mrf.mxu1 }
 0x332   :  { %v5433_v36 = vpop.f32.mrf.mxu0 }
 0x333   :  { %v5441_v38 = vpop.f32.mrf.mxu1 }
 0x334   :  { %v506_v39 = vpop.f32.mrf.mxu0 }
 0x335   :  { %v606_v40 = vpop.f32.mrf.mxu1  ;;  %v507_v16 = vadd.f32 %v506_v39, %v409_v28 }
 0x336   :  { %v5436_v41 = vpop.f32.mrf.mxu0 }
 0x337   :  { %v522_v42 = vadd.f32 %v5436_v41, %v5428_v26  ;;  %v5444_v43 = vpop.f32.mrf.mxu1 }
 0x338   :  { %v516_v45 = vpop.f32.mrf.mxu0 }
 0x339   :  { %v517_v46 = vadd.f32 %v516_v45, %v419_v29  ;;  %v628_v47 = vadd.f32 %v5444_v43, %v522_v42  ;;  %v616_v48 = vpop.f32.mrf.mxu1 }
 0x33a   :  { %v5449_v50 = vpop.f32.mrf.mxu0 }
 0x33b   :  { %v627_v51 = vadd.f32 %v616_v48, %v517_v46  ;;  %v5457_v55 = vpop.f32.mrf.mxu1  ;;  %v512_v48 = vadd.f32 %v5433_v36, %v5425_v25  ;;  %v6882_v36 = vmov 0.0  }
 0x33c   :  { %v710_v58 = vpop.f32.mrf.mxu0 }
 0x33d   :  { %v803_v62 = vpop.f32.mrf.mxu1  ;;  %v626_v4 = vadd.f32 %v5441_v38, %v512_v48 }
 0x33e   :  { %v5452_v3 = vpop.f32.mrf.mxu0 }
 0x33f   :  { %v6297_v6 = vadd.f32 %v5452_v3, %v628_v47  ;;  %v5460_v17 = vpop.f32.mrf.mxu1 }
 0x340   :  { %v720_v18 = vpop.f32.mrf.mxu0 }
 0x341   :  { %v6299_v19 = vadd.f32 %v720_v18, %v627_v51  ;;  %v813_v21 = vpop.f32.mrf.mxu1 }
 0x342   :  { %v5465_v23 = vpop.f32.mrf.mxu0 }
 0x343   :  { %v5473_v26 = vpop.f32.mrf.mxu1  ;;  %v894_v9 = vadd.f32 %v5465_v23, %v5457_v55 }
 0x344   :  { %v888_v41 = vpop.f32.mrf.mxu0 }
 0x345   :  { %v976_v29 = vpop.f32.mrf.mxu1  ;;  %v889_v43 = vadd.f32 %v888_v41, %v803_v62  ;;  %v996_v1 = vadd.f32 %v5473_v26, %v894_v9  ;;  %v625_v62 = vadd.f32 %v606_v40, %v507_v16 }
 0x346   :  { %v5468_v42 = vpop.f32.mrf.mxu0 }
 0x347   :  { %v904_v45 = vadd.f32 %v5468_v42, %v5460_v17  ;;  %v5476_v46 = vpop.f32.mrf.mxu1  ;;  %v995_v51 = vadd.f32 %v976_v29, %v889_v43  ;;  %v730_v17 = vadd.f32 %v5449_v50, %v626_v4 }
 0x348   :  { %v898_v49 = vpop.f32.mrf.mxu0 }
 0x349   :  { %v899_v61 = vadd.f32 %v898_v49, %v813_v21  ;;  %v998_v47 = vadd.f32 %v5476_v46, %v904_v45  ;;  %v986_v3 = vpop.f32.mrf.mxu1  ;;  %v729_v49 = vadd.f32 %v710_v58, %v625_v62 }
 0x34a   :  { %v5481_v59 = vpop.f32.mrf.mxu0 }
 0x34b   :  { %v997_v18 = vadd.f32 %v986_v3, %v899_v61  ;;  %v1088_v5 = vadd.f32 %v5481_v59, %v996_v1  ;;  %v5489_v56 = vpop.f32.mrf.mxu1 }
 0x34c   :  { %v1068_v53 = vpop.f32.mrf.mxu0 }
 0x34d   :  { %v1087_v23 = vadd.f32 %v1068_v53, %v995_v51  ;;  %5528 = vmatpush3.xpose.msk.msra.mxu0 %vm330_vm2, %v1088_v5  ;;  %v1161_v55 = vpop.f32.mrf.mxu1 }
 0x34e   :  { %v5484_v25 = vpop.f32.mrf.mxu0  ;;  %5537 = vmatprep.subr.mxu0 %v6882_v36 }
 0x34f   :  { %v6303_v9 = vadd.f32 %v5484_v25, %v998_v47  ;;  %5518 = vmatpush3.xpose.msk.msra.mxu1 %vm330_vm2, %v1087_v23  ;;  %v5492_v21 = vpop.f32.mrf.mxu1 }
 0x350   :  { %v1078_v61 = vpop.f32.mrf.mxu0  ;;  %5530 = vmatmul.mubr.msk.f32.vlgmr.msra.gmra.mxu0 %vm330_vm2, %v730_v17  ;;  %5522 = vmatprep.subr.mxu1 %v6882_v36 }
 0x351   :  { %v6308_v53 = vadd.f32 %v1078_v61, %v997_v18  ;;  %v1171_v59 = vpop.f32.mrf.mxu1  ;;  %5539 = vmatprep.mubr.msk.f32.mxu0 %vm5914_vm1, %v6882_v36 }
 0x352   :  { %5520 = vmatmul.mubr.msk.f32.vlgmr.msra.gmra.mxu1 %vm330_vm2, %v729_v49  ;;  %v5497_v1 = vpop.f32.mrf.mxu0 }
 0x353   :  { %v1252_v4 = vadd.f32 %v5497_v1, %v5489_v56  ;;  %5524 = vmatprep.mubr.msk.f32.mxu1 %vm5914_vm1, %v6882_v36 }
 0x354   :  { %v1246_v5 = vpop.f32.mrf.mxu0  ;;  %v5505_v16 = vpop.f32.mrf.mxu1 }
 0x355   :  { %v1247_v28 = vadd.f32 %v1246_v5, %v1161_v55  ;;  %v1354_v38 = vadd.f32 %v5505_v16, %v1252_v4 }
 0x356   :  { %v5500_v39 = vpop.f32.mrf.mxu0  ;;  %v1334_v40 = vpop.f32.mrf.mxu1 }
 0x357   :  { %v1262_v50 = vadd.f32 %v5500_v39, %v5492_v21  ;;  %v1353_v29 = vadd.f32 %v1334_v40, %v1247_v28 }
 0x358   :  { %v1256_v58 = vpop.f32.mrf.mxu0  ;;  %v5508_v26 = vpop.f32.mrf.mxu1 }
 0x359   :  { %v1257_v41 = vadd.f32 %v1256_v58, %v1171_v59  ;;  %v1356_v42 = vadd.f32 %v5508_v26, %v1262_v50 }
 0x35a   :  { %v5513_v43 = vpop.f32.mrf.mxu0  ;;  %v1344_v51 = vpop.f32.mrf.mxu1 }
 0x35b   :  { %v1446_v45 = vadd.f32 %v5513_v43, %v1354_v38 }
 0x35c   :  { %v1426_v46 = vpop.f32.mrf.mxu0 }
 0x35d   :  { %v1445_v48 = vadd.f32 %v1426_v46, %v1353_v29  ;;  %v6329_v46 = vld [vmem:[%s6846_s2] sm:$0xff] }
 0x35e   :  { %v5516_v56 = vpop.f32.mrf.mxu0 }
 0x35f   :  { %v6315_v47 = vadd.f32 %v5516_v56, %v1356_v42  ;;  %5523 = vmatpush3.msra.mxu1 %v1445_v48  ;;  %v1355_v48 = vadd.f32 %v1344_v51, %v1257_v41 }
 0x360   :  { %5532 = vmatprep.subr.mxu1 %v6882_v36  ;;  %v1436_v3 = vpop.f32.mrf.mxu0 }
 0x361   :  { %v1447_v56 = vadd.f32 %v1436_v3, %v1355_v48 }
 0x410   :  { %v1682_v18 = vpop.f32.mrf.mxu0 }
 0x411   :  { %v1686_v23 = vmul.f32 0.35355338, %v1682_v18 }
 0x412   :  { %v1521_v55 = vpop.f32.mrf.mxu1  ;;  %v5531_v62 = vpop.f32.mrf.mxu0 }
 0x413   :  { %v1525_v17 = vmul.f32 0.35355338, %v1521_v55  ;;  %v1687_v25 = vsel %vm330_vm2, %v1686_v23, -inf }
 0x414   :  { %1688 = vmax.xlane.f32.xlu1 %v1687_v25  ;;  %v5521_v21 = vpop.f32.mrf.mxu1 }
 0x415   :  { %v1526_v49 = vsel %vm330_vm2, %v1525_v17, -inf }
 0x416   :  { %1527 = vmax.xlane.f32.xlu0 %v1526_v49 }
 0x49d   :  { %v1689_v61 = vpop.xlane.xlu1 %1688 }
 0x49e   :  { %v1690_v59 = vsub.f32 %v1686_v23, %v1689_v61 }
 0x49f   :  { %v1528_v1 = vpop.xlane.xlu0 %1527 }
 0x4a0   :  { %v1529_v4 = vsub.f32 %v1525_v17, %v1528_v1  ;;  %v1691_v5 = vmul.f32 1.442695, %v1690_v59 }
 0x4a2   :  { %v1530_v16 = vmul.f32 1.442695, %v1529_v4 }
 0x4a4   :  { %5838 = vpow2.f32 %v1530_v16  ;;  %v6362_v16 = vld [vmem:[%s6846_s2 + $0x10] sm:$0xff] }
 0x4a5   :  { %5840 = vpow2.f32 %v1691_v5 }
 0x4b1   :  { %v5839_v28 = vpop.eup %5838 }
 0x4b2   :  { %v1532_v38 = vsel %vm330_vm2, %v5839_v28, 0.0  ;;  %v5841_v39 = vpop.eup %5840 }
 0x4b3   :  { %1533 = vadd.xlane.f32.xlu0 %v1532_v38  ;;  %v1693_v40 = vsel %vm330_vm2, %v5841_v39, 0.0 }
 0x4b7   :  { %1694 = vadd.xlane.f32.xlu0 %v1693_v40 }
 0x53c   :  { %v1534_v50 = vpop.xlane.xlu0 %1533 }
 0x53d   :  { %5842 = vrcp.f32 %v1534_v50 }
 0x540   :  { %v1695_v58 = vpop.xlane.xlu0 %1694 }
 0x541   :  { %5844 = vrcp.f32 %v1695_v58 }
 0x54a   :  { %v5843_v26 = vpop.eup %5842 }
 0x54b   :  { %v1536_v29 = vmul.f32 %v5843_v26, %v5839_v28 }
 0x54d   :  { %5525 = vmatmul.mubr.msk.f32.vlgmr.msra.gmra.mxu1 %vm330_vm2, %v1536_v29 }
 0x54e   :  { %v5845_v42 = vpop.eup %5844  ;;  %5533 = vmatpush3.msra.mxu1 %v1446_v45  ;;  %5534 = vmatprep.mubr.msk.f32.mxu1 %vm5914_vm1, %v6882_v36  ;;  %v6339_v45 = vld [vmem:[%s6846_s2 + $0x8] sm:$0xff] }
 0x54f   :  { %v1697_v43 = vmul.f32 %v5845_v42, %v5841_v39  ;;  %5542 = vmatprep.subr.mxu1 %v6882_v36  ;;  %5538 = vmatpush3.msra.mxu0 %v6339_v45 }
 0x550   :  { %5547 = vmatprep.subr.mxu0 %v6882_v36 }
 0x551   :  { %5535 = vmatmul.mubr.msk.f32.vlgmr.msra.gmra.mxu1 %vm330_vm2, %v1697_v43 }
 0x552   :  { %5543 = vmatpush3.msra.mxu1 %v6329_v46  ;;  %5544 = vmatprep.mubr.msk.f32.mxu1 %vm5914_vm1, %v6882_v36 }
 0x553   :  { %5552 = vmatprep.subr.mxu1 %v6882_v36 }
 0x60d   :  { %v1606_v18 = vpop.f32.mrf.mxu1 }
 0x60e   :  { %5545 = vmatmul.mubr.msk.f32.vlgmr.msra.gmra.mxu1 %vm330_vm2, %v1606_v18 }
 0x60f   :  { %5553 = vmatpush3.msra.mxu1 %v1447_v56  ;;  %v5526_v23 = vpop.f32.mrf.mxu1  ;;  %5554 = vmatprep.mubr.msk.f32.mxu1 %vm5914_vm1, %v6882_v36 }
 0x610   :  { %5562 = vmatprep.subr.mxu1 %v6882_v36 }
 0x611   :  { %v1767_v55 = vpop.f32.mrf.mxu1 }
 0x612   :  { %5540 = vmatmul.mubr.msk.f32.vlgmr.msra.gmra.mxu0 %vm330_vm2, %v1767_v55 }
 0x613   :  { %5548 = vmatpush3.xpose.msk.msra.mxu0 %vm330_vm2, %v6308_v53  ;;  %v5536_v62 = vpop.f32.mrf.mxu1  ;;  %5549 = vmatprep.mubr.msk.f32.mxu0 %vm5914_vm1, %v6882_v36 }
 0x614   :  { %5557 = vmatprep.subr.mxu0 %v6882_v36 }
 0x616   :  { %5550 = vmatmul.mubr.msk.f32.vlgmr.msra.gmra.mxu0 %vm330_vm2, %v6299_v19 }
 0x617   :  { %5559 = vmatprep.mubr.msk.f32.mxu0 %vm5914_vm1, %v6882_v36  ;;  %5558 = vmatpush3.msra.mxu0 %v6362_v16 }
 0x618   :  { %5567 = vmatprep.subr.mxu0 %v6882_v36 }
 0x6ce   :  { %v1913_v41 = vpop.f32.mrf.mxu1 }
 0x6d0   :  { %v5546_v3 = vpop.f32.mrf.mxu1 }
 0x6d1   :  { %v6389_v3 = vld [vmem:[%s6846_s2 + $0x18] sm:$0xff] }
 0x6d2   :  { %v1840_v51 = vpop.f32.mrf.mxu0 }
 0x6d3   :  { %v1914_v17 = vadd.f32 %v1913_v41, %v1840_v51  ;;  %v6395_v51 = vld [vmem:[%s6844_s0 + $0x8] sm:$0xff] }
 0x6d4   :  { %v5541_v25 = vpop.f32.mrf.mxu0 }
 0x6d6   :  { %v1989_v21 = vpop.f32.mrf.mxu0 }
 0x6d7   :  { %v1993_v49 = vmul.f32 0.35355338, %v1989_v21 }
 0x6d8   :  { %v5551_v53 = vpop.f32.mrf.mxu0 }
 0x6d9   :  { %v1994_v61 = vsel %vm330_vm2, %v1993_v49, -inf }
 0x6da   :  { %1995 = vmax.xlane.f32.xlu1 %v1994_v61 }
 0x763   :  { %v1996_v59 = vpop.xlane.xlu1 %1995 }
 0x764   :  { %v1997_v1 = vsub.f32 %v1993_v49, %v1996_v59 }
 0x766   :  { %v1998_v4 = vmul.f32 1.442695, %v1997_v1 }
 0x768   :  { %5846 = vpow2.f32 %v1998_v4  ;;  %v2389_v4 = vsub.s32 5, %v6031_v20 }
 0x775   :  { %v5847_v5 = vpop.eup %5846 }
 0x776   :  { %v2000_v19 = vsel %vm330_vm2, %v5847_v5, 0.0 }
 0x777   :  { %2001 = vadd.xlane.f32.xlu0 %v2000_v19 }
 0x800   :  { %v2002_v28 = vpop.xlane.xlu0 %2001 }
 0x801   :  { %5848 = vrcp.f32 %v2002_v28 }
 0x80e   :  { %v5849_v38 = vpop.eup %5848 }
 0x80f   :  { %v2004_v39 = vmul.f32 %v5849_v38, %v5847_v5  ;;  %v6407_v5 = vrot.slane %v6037_v22, %v2389_v4 }
 0x811   :  { %5555 = vmatmul.mubr.msk.f32.vlgmr.msra.gmra.mxu1 %vm330_vm2, %v2004_v39 }
 0x812   :  { %5563 = vmatpush3.xpose.msk.msra.mxu1 %vm330_vm2, %v6303_v9  ;;  %5564 = vmatprep.mubr.msk.f32.mxu1 %vm5914_vm1, %v6882_v36 }
 0x813   :  { %5572 = vmatprep.subr.mxu1 %v6882_v36 }
 0x815   :  { %5565 = vmatmul.mubr.msk.f32.vlgmr.msra.gmra.mxu1 %vm330_vm2, %v6297_v6 }
 0x816   :  { %5574 = vmatprep.mubr.msk.f32.mxu1 %vm5914_vm1, %v6882_v36  ;;  %5573 = vmatpush3.msra.mxu1 %v6389_v3 }
 0x817   :  { %5588 = vmatprep.subr.mxu1 %v6882_v36 }
 0x8d1   :  { %v2074_v40 = vpop.f32.mrf.mxu1 }
 0x8d2   :  { %5560 = vmatmul.mubr.msk.f32.vlgmr.msra.gmra.mxu0 %vm330_vm2, %v2074_v40 }
 0x8d3   :  { %5568 = vmatpush3.msra.mxu0 %v6315_v47  ;;  %v5556_v50 = vpop.f32.mrf.mxu1  ;;  %5569 = vmatprep.mubr.msk.f32.mxu0 %vm5914_vm1, %v6882_v36 }
 0x8d4   :  { %5577 = vmatprep.subr.mxu0 %v6882_v36 }
 0x8d5   :  { %v2224_v9 = vpop.f32.mrf.mxu1 }
 0x8d6   :  { %v2228_v58 = vmul.f32 0.35355338, %v2224_v9 }
 0x8d7   :  { %v5566_v26 = vpop.f32.mrf.mxu1 }
 0x8d8   :  { %v2229_v29 = vsel %vm330_vm2, %v2228_v58, -inf }
 0x8d9   :  { %2230 = vmax.xlane.f32.xlu1 %v2229_v29 }
 0x962   :  { %v2231_v6 = vpop.xlane.xlu1 %2230 }
 0x963   :  { %v2232_v42 = vsub.f32 %v2228_v58, %v2231_v6 }
 0x965   :  { %v2233_v43 = vmul.f32 1.442695, %v2232_v42  ;;  %v6420_v42 = vld [vmem:[%s6847_s3 + $0x18] sm:$0xff] }
 0x967   :  { %5850 = vpow2.f32 %v2233_v43  ;;  %v6432_v43 = vld [vmem:[%s6847_s3 + $0x8] sm:$0xff] }
 0x974   :  { %v5851_v48 = vpop.eup %5850 }
 0x975   :  { %v2235_v56 = vsel %vm330_vm2, %v5851_v48, 0.0 }
 0x976   :  { %2236 = vadd.xlane.f32.xlu0 %v2235_v56 }
 0x992   :  { %v2147_v47 = vpop.f32.mrf.mxu0 }
 0x993   :  { %v2151_v18 = vadd.f32 %v2147_v47, %v1914_v17  ;;  %v2584_v17 = vsel %vm76_vm0, %v6395_v51, 0.0 }
 0x994   :  { %v5561_v23 = vpop.f32.mrf.mxu0  ;;  %2585 = vadd.xlane.f32.xlu0 %v2584_v17  ;;  %v2413_v17 = vsub.s32 7, %v6031_v20 }
 0x9ff   :  { %v2237_v55 = vpop.xlane.xlu0 %2236 }
 0xa00   :  { %5852 = vrcp.f32 %v2237_v55 }
 0xa0d   :  { %v5853_v62 = vpop.eup %5852 }
 0xa0e   :  { %v2239_v41 = vmul.f32 %v5853_v62, %v5851_v48  ;;  %v6439_v48 = vld [vmem:[%s6847_s3] sm:$0xff] }
 0xa10   :  { %5570 = vmatmul.mubr.msk.f32.vlgmr.msra.gmra.mxu0 %vm330_vm2, %v2239_v41  ;;  %v2408_v41 = vsub.s32 6, %v6031_v20 }
 0xa11   :  { %5585 = vmatprep.mubr.msk.f32.mxu0 %vm5914_vm1, %v6882_v36  ;;  %5578 = vmatpush3.msra.mxu0 %v6420_v42 }
 0xa12   :  { %5579 = vmatprep.subr.mxu0 %v6882_v36 }
 0xa1d   :  { %v2586_v49 = vpop.xlane.xlu0 %2585 }
 0xa1e   :  { %v2587_v53 = vmul.f32 0.03125, %v2586_v49 }
 0xa20   :  { %v2588_v61 = vsub.f32 %v6395_v51, %v2587_v53  ;;  %v6451_v53 = vrot.slane %v6037_v22, %v2413_v17 }
 0xa22   :  { %v2589_v59 = vmul.f32 %v2588_v61, %v2588_v61 }
 0xa24   :  { %v2590_v1 = vsel %vm76_vm0, %v2589_v59, 0.0 }
 0xa25   :  { %2591 = vadd.xlane.f32.xlu0 %v2590_v1 }
 0xaae   :  { %v2592_v56 = vpop.xlane.xlu0 %2591 }
 0xaaf   :  { %v2593_v47 = vmul.f32 0.03125, %v2592_v56 }
 0xab1   :  { %v2594_v55 = vadd.f32 1e-05, %v2593_v47 }
 0xad0   :  { %v2309_v25 = vpop.f32.mrf.mxu0 }
 0xad1   :  { %5575 = vmatmul.mubr.msk.f32.vlgmr.msra.gmra.mxu1 %vm330_vm2, %v2309_v25  ;;  %v6448_v25 = vrot.slane %v6037_v22, %v2408_v41 }
 0xad2   :  { %v5571_v21 = vpop.f32.mrf.mxu0  ;;  %5604 = vmatprep.mubr.msk.f32.mxu1 %vm5914_vm1, %v6882_v36 }
 0xb91   :  { %v2382_v19 = vpop.f32.mrf.mxu1 }
 0xb92   :  { %v2386_v28 = vadd.f32 %v2382_v19, %v2151_v18 }
 0xb93   :  { %v5576_v38 = vpop.f32.mrf.mxu1 }
 0xb94   :  { %v2391_v39 = vadd.f32 %v6407_v5, %v2386_v28 }
 0xb96   :  { %v6411_v40 = vadd.f32 %v2391_v39, %v5964_v0  ;;  %v6426_v0 = vld [vmem:[%s6847_s3 + $0x10] sm:$0xff] }
 0xb97   :  { %5580 = vmatpush3.msra.mxu0 %v6426_v0 }
 0xb98   :  { %v2393_v50 = vsel %vm76_vm0, %v6411_v40, 0.0  ;;  %5581 = vmatprep.subr.mxu0 %v6882_v36 }
 0xb99   :  { %2394 = vadd.xlane.f32.xlu1 %v2393_v50  ;;  %5582 = vmatpush3.msra.mxu0 %v6432_v43 }
 0xb9a   :  { %5583 = vmatprep.subr.mxu0 %v6882_v36 }
 0xb9b   :  { %5584 = vmatpush3.msra.mxu0 %v6439_v48 }
 0xb9c   :  { %5607 = vmatprep.subr.mxu0 %v6882_v36 }
 0xc22   :  { %v2395_v9 = vpop.xlane.xlu1 %2394 }
 0xc23   :  { %v2396_v58 = vmul.f32 0.03125, %v2395_v9 }
 0xc25   :  { %v2397_v26 = vsub.f32 %v6411_v40, %v2396_v58 }
 0xc27   :  { %v2398_v29 = vmul.f32 %v2397_v26, %v2397_v26 }
 0xc29   :  { %v2399_v6 = vsel %vm76_vm0, %v2398_v29, 0.0 }
 0xc2a   :  { %2400 = vadd.xlane.f32.xlu1 %v2399_v6 }
 0xcb3   :  { %v2401_v18 = vpop.xlane.xlu1 %2400 }
 0xcb4   :  { %v2402_v23 = vmul.f32 0.03125, %v2401_v18 }
 0xcb6   :  { %v2403_v62 = vadd.f32 1e-05, %v2402_v23 }
 0xcb8   :  { %5854 = vrsqrt.f32 %v2403_v62 }
 0xcb9   :  { %5856 = vrsqrt.f32 %v2594_v55 }
 0xcc5   :  { %v5855_v21 = vpop.eup %5854 }
 0xcc6   :  { %v2405_v49 = vmul.f32 %v5855_v21, %v2397_v26  ;;  %v5857_v59 = vpop.eup %5856 }
 0xcc7   :  { %v2596_v4 = vmul.f32 %v5857_v59, %v2588_v61  ;;  %v6887_v59 = vld [vmem:[#allocation12_spill] sm:$0xff] }
 0xcc8   :  { %v2410_v1 = vmul.f32 %v6448_v25, %v2405_v49  ;;  %v6886_v49 = vld [vmem:[#allocation7_spill] sm:$0xff] }
 0xcc9   :  { %v2597_v28 = vmul.f32 %v2596_v4, %v6043_v24  ;;  %v6544_v24 = vld [vmem:[%s6849_s5 + $0x8] sm:$0x3] }
 0xcca   :  { %v2415_v19 = vadd.f32 %v6451_v53, %v2410_v1  ;;  %v6888_v1 = vld [vmem:[#allocation8_spill] sm:$0xff] }
 0xccb   :  { %v6466_v22 = vadd.f32 %v2597_v28, %v6048_v27  ;;  %v6883_v27 = vsub.s32 1, %v6031_v20  ;;  %v6890_v28 = vld [vmem:[#allocation9_spill] sm:$0xff] }
 0xccc   :  { %5586 = vmatmul.mubr.msk.f32.vlgmr.msra.gmra.mxu0 %vm76_vm0, %v2415_v19 }
 0xccd   :  { %5608 = vmatpush3.msra.mxu0 %v5973_v7  ;;  %5615 = vmatprep.mubr.msk.f32.mxu0 %vm5914_vm1, %v6882_v36  ;;  %v6488_v7 = vld [vmem:[%s6848_s4 + $0x38] sm:$0xff] }
 0xcce   :  { %5609 = vmatprep.subr.mxu0 %v6882_v36  ;;  %5589 = vmatpush3.msra.mxu1 %v6488_v7 }
 0xccf   :  { %5610 = vmatpush3.msra.mxu0 %v5985_v10  ;;  %5590 = vmatprep.subr.mxu1 %v6882_v36  ;;  %v6502_v10 = vld [vmem:[%s6848_s4 + $0x28] sm:$0xff] }
 0xcd0   :  { %5611 = vmatprep.subr.mxu0 %v6882_v36 }
 0xcd1   :  { %5612 = vmatpush3.msra.mxu0 %v5999_v12  ;;  %v6516_v12 = vld [vmem:[%s6848_s4 + $0x18] sm:$0xff] }
 0xcd2   :  { %5613 = vmatprep.subr.mxu0 %v6882_v36 }
 0xcd3   :  { %5614 = vmatpush3.msra.mxu0 %v6013_v14  ;;  %v6528_v14 = vld [vmem:[%s6848_s4 + $0x8] sm:$0xff] }
 0xcd4   :  { %5616 = vmatmul.mubr.msk.f32.vlgmr.msra.gmra.mxu0 %vm76_vm0, %v6466_v22  ;;  %5618 = vmatprep.subr.mxu0 %v6882_v36 }
 0xcd5   :  { %5619 = vmatpush3.msra.mxu0 %v5978_v8  ;;  %5626 = vmatprep.mubr.msk.f32.mxu0 %vm5914_vm1, %v6882_v36  ;;  %v6495_v8 = vld [vmem:[%s6848_s4 + $0x30] sm:$0xff] }
 0xcd6   :  { %5620 = vmatprep.subr.mxu0 %v6882_v36  ;;  %5591 = vmatpush3.msra.mxu1 %v6495_v8 }
 0xcd7   :  { %5621 = vmatpush3.msra.mxu0 %v5990_v11  ;;  %5592 = vmatprep.subr.mxu1 %v6882_v36  ;;  %v6507_v11 = vld [vmem:[%s6848_s4 + $0x20] sm:$0xff] }
 0xcd8   :  { %5622 = vmatprep.subr.mxu0 %v6882_v36  ;;  %5593 = vmatpush3.msra.mxu1 %v6502_v10 }
 0xcd9   :  { %5623 = vmatpush3.msra.mxu0 %v6004_v13  ;;  %5594 = vmatprep.subr.mxu1 %v6882_v36  ;;  %v6521_v13 = vld [vmem:[%s6848_s4 + $0x10] sm:$0xff] }
 0xcda   :  { %5624 = vmatprep.subr.mxu0 %v6882_v36  ;;  %5595 = vmatpush3.msra.mxu1 %v6507_v11 }
 0xcdb   :  { %5625 = vmatpush3.msra.mxu0 %v6020_v15  ;;  %5596 = vmatprep.subr.mxu1 %v6882_v36  ;;  %v6535_v15 = vld [vmem:[%s6848_s4] sm:$0xff] }
 0xcdc   :  { %5627 = vmatmul.mubr.msk.f32.vlgmr.msra.gmra.mxu0 %vm76_vm0, %v6466_v22  ;;  %5597 = vmatpush3.msra.mxu1 %v6516_v12 }
 0xcdd   :  { %5642 = vmatprep.mubr.msk.f32.mxu0 %vm330_vm2, %v6087_v34  ;;  %5598 = vmatprep.subr.mxu1 %v6882_v36  ;;  %v6549_v34 = vrot.slane %v6544_v24, %v6883_v27  ;;  %v5880_v27 = vld [vmem:[%s6850_s6 + $0x20] sm:$0xff] }
 0xcde   :  { %5599 = vmatpush3.msra.mxu1 %v6521_v13 }
 0xcdf   :  { %5600 = vmatprep.subr.mxu1 %v6882_v36 }
 0xce0   :  { %5601 = vmatpush3.msra.mxu1 %v6528_v14 }
 0xce1   :  { %5602 = vmatprep.subr.mxu1 %v6882_v36 }
 0xce2   :  { %5603 = vmatpush3.msra.mxu1 %v6535_v15 }
 0xce3   :  { %5629 = vmatprep.subr.mxu1 %v6882_v36 }
 0xd8c   :  { %v2489_v61 = vpop.f32.mrf.mxu0 }
 0xd8d   :  { %v2490_v38 = vadd.f32 %v2489_v61, %v6549_v34  ;;  %v6619_v61 = vld [vmem:[%s6850_s6 + $0x30] sm:$0xff] }
 0xd8e   :  { %v5587_v39 = vpop.f32.mrf.mxu0 }
 0xd8f   :  { %v2494_v50 = vmul.f32 0.044715, %v2490_v38  ;;  %v2493_v62 = vmul.f32 0.5, %v2490_v38 }
 0xd91   :  { %v2495_v9 = vmul.f32 %v2494_v50, %v2490_v38 }
 0xd93   :  { %v2496_v58 = vmul.f32 %v2495_v9, %v2490_v38 }
 0xd94   :  { %v2668_v26 = vpop.f32.mrf.mxu0 }
 0xd95   :  { %v2497_v29 = vadd.f32 %v2496_v58, %v2490_v38  ;;  %v2669_v6 = vadd.f32 %v2668_v26, %v6100_v37 }
 0xd96   :  { %v5617_v56 = vpop.f32.mrf.mxu0 }
 0xd97   :  { %v2498_v47 = vmul.f32 0.7978846, %v2497_v29  ;;  %2986 = vrot.lane.b32.xlu0 %v2669_v6, %s5917_s11  ;;  %2813 = vrot.lane.b32.xlu1 %v2669_v6, %s5916_s10 }
 0xd99   :  { %5858 = vtanh.f32 %v2498_v47 }
 0xd9b   :  { %3078 = vrot.lane.b32.xlu1 %v2669_v6, %s5915_s1 }
 0xd9c   :  { %v2738_v18 = vpop.f32.mrf.mxu0 }
 0xd9d   :  { %v2739_v23 = vadd.f32 %v2738_v18, %v6107_v44  ;;  %v6885_v44 = vld [vmem:[#allocation11_spill] sm:$0xff] }
 0xd9e   :  { %v5628_v55 = vpop.f32.mrf.mxu0 }
 0xd9f   :  { %3344 = vrot.lane.b32.xlu0 %v2739_v23, %s5917_s11  ;;  %3171 = vrot.lane.b32.xlu1 %v2739_v23, %s5916_s10 }
 0xda3   :  { %3436 = vrot.lane.b32.xlu1 %v2739_v23, %s5915_s1 }
 0xda6   :  { %v5859_v37 = vpop.eup %5858 }
 0xda7   :  { %v2500_v41 = vadd.f32 1.0, %v5859_v37 }
 0xda9   :  { %v2501_v17 = vmul.f32 %v2500_v41, %v2493_v62 }
 0xdab   :  { %5605 = vmatmul.mubr.msk.f32.vlgmr.msra.gmra.mxu1 %vm2506_vm3, %v2501_v17 }
 0xdac   :  { %5630 = vmatpush3.msra.mxu1 %v6055_v30  ;;  %5637 = vmatprep.mubr.msk.f32.mxu1 %vm5914_vm1, %v6882_v36 }
 0xdad   :  { %5631 = vmatprep.subr.mxu1 %v6882_v36 }
 0xdae   :  { %5632 = vmatpush3.msra.mxu1 %v6062_v31 }
 0xdaf   :  { %5633 = vmatprep.subr.mxu1 %v6882_v36 }
 0xdb0   :  { %5634 = vmatpush3.msra.mxu1 %v6071_v32 }
 0xdb1   :  { %5635 = vmatprep.subr.mxu1 %v6882_v36 }
 0xdb2   :  { %5636 = vmatpush3.msra.mxu1 %v6078_v33  ;;  %v6884_v33 = vld [vmem:[#allocation6_spill] sm:$0xff] }
 0xdb3   :  { %5638 = vmatmul.mubr.msk.f32.vlgmr.msra.gmra.mxu1 %vm76_vm0, %v6466_v22  ;;  %5648 = vmatprep.subr.mxu1 %v2669_v6  ;;  %v6891_v22 = vld [vmem:[#allocation10_spill] sm:$0xff] }
 0xdb4   :  { %5649 = vmatpush3.msra.mxu1 %v2669_v6  ;;  %5650 = vmatprep.mubr.msk.f32.mxu1 %vm330_vm2, %v6140_v54 }
 0xdb7   :  { %5651 = vmatmul.mubr.msk.f32.vlgmr.msra.gmra.mxu1 %vm330_vm2, %v6156_v57 }
 0xdb8   :  { %5653 = vmatprep.mubr.msk.f32.mxu1 %vm330_vm2, %v6170_v60 }
 0xdbb   :  { %5654 = vmatmul.mubr.msk.f32.gmra.mxu1 %vm330_vm2, %v6182_v63 }
 0xdbc   :  { %5666 = vmatprep.mubr.msk.f32.mxu1 %vm330_vm2, %v6192_v2 }
 0xe09   :  { %v2814_v30 = vpop.permute.xlu1 %2813  ;;  %v2987_v31 = vpop.permute.xlu0 %2986 }
 0xe0a   :  { %5640 = vmatprep.subr.mxu0 %v2814_v30 }
 0xe0b   :  { %5641 = vmatpush3.msra.mxu0 %v2814_v30 }
 0xe0c   :  { %5643 = vmatmul.mubr.msk.f32.vlgmr.msra.gmra.mxu0 %vm330_vm2, %v6130_v52  ;;  %5656 = vmatprep.subr.mxu0 %v2987_v31 }
 0xe0d   :  { %5657 = vmatpush3.msra.mxu0 %v2987_v31  ;;  %v3079_v32 = vpop.permute.xlu1 %3078  ;;  %5645 = vmatprep.mubr.msk.f32.mxu0 %vm330_vm2, %v6092_v35  ;;  %v6889_v35 = vld [vmem:[#allocation13_spill] sm:$0xff] }
 0xe0e   :  { %5664 = vmatprep.subr.mxu1 %v3079_v32 }
 0xe0f   :  { %5665 = vmatpush3.msra.mxu1 %v3079_v32 }
 0xe10   :  { %5646 = vmatmul.mubr.msk.f32.gmra.mxu0 %vm330_vm2, %v6884_v33  ;;  %5667 = vmatmul.mubr.msk.f32.vlgmr.msra.gmra.mxu1 %vm330_vm2, %v6885_v44 }
 0xe11   :  { %5680 = vmatprep.subr.mxu1 %v2739_v23  ;;  %v3172_v21 = vpop.permute.xlu1 %3171  ;;  %5658 = vmatprep.mubr.msk.f32.mxu0 %vm330_vm2, %v6886_v49  ;;  %v3345_v4 = vpop.permute.xlu0 %3344 }
 0xe12   :  { %5681 = vmatpush3.msra.mxu1 %v2739_v23  ;;  %5672 = vmatprep.subr.mxu0 %v3172_v21 }
 0xe13   :  { %5669 = vmatprep.mubr.msk.f32.mxu1 %vm330_vm2, %v6887_v59 }
 0xe14   :  { %5659 = vmatmul.mubr.msk.f32.vlgmr.msra.gmra.mxu0 %vm330_vm2, %v6888_v1  ;;  %5670 = vmatmul.mubr.msk.f32.gmra.mxu1 %vm330_vm2, %v6889_v35 }
 0xe15   :  { %5673 = vmatpush3.msra.mxu0 %v3172_v21  ;;  %v3437_v19 = vpop.permute.xlu1 %3436  ;;  %5661 = vmatprep.mubr.msk.f32.mxu0 %vm330_vm2, %v6890_v28 }
 0xe16   :  { %5688 = vmatprep.subr.mxu0 %v3345_v4  ;;  %5696 = vmatprep.subr.mxu1 %v3437_v19 }
 0xe17   :  { %5682 = vmatprep.mubr.msk.f32.mxu1 %vm330_vm2, %v6140_v54 }
 0xe18   :  { %5662 = vmatmul.mubr.msk.f32.gmra.mxu0 %vm330_vm2, %v6891_v22  ;;  %5683 = vmatmul.mubr.msk.f32.vlgmr.msra.gmra.mxu1 %vm330_vm2, %v6156_v57 }
 0xe19   :  { %5697 = vmatpush3.msra.mxu1 %v3437_v19  ;;  %5674 = vmatprep.mubr.msk.f32.mxu0 %vm330_vm2, %v5880_v27 }
 0xe1a   :  { %5685 = vmatprep.mubr.msk.f32.mxu1 %vm330_vm2, %v6170_v60 }
 0xe1c   :  { %5675 = vmatmul.mubr.msk.f32.vlgmr.msra.gmra.mxu0 %vm330_vm2, %v6130_v52  ;;  %5686 = vmatmul.mubr.msk.f32.gmra.mxu1 %vm330_vm2, %v6182_v63  ;;  %v6892_v52 = vsub.s32 0, %v6031_v20 }
 0xe1d   :  { %5689 = vmatpush3.msra.mxu0 %v3345_v4  ;;  %5677 = vmatprep.mubr.msk.f32.mxu0 %vm330_vm2, %v6619_v61 }
 0xe1e   :  { %5698 = vmatprep.mubr.msk.f32.mxu1 %vm330_vm2, %v6192_v2  ;;  %v6647_v38 = vrot.slane %v6544_v24, %v6892_v52 }
 0xe20   :  { %5678 = vmatmul.mubr.msk.f32.gmra.mxu0 %vm330_vm2, %v6884_v33  ;;  %5699 = vmatmul.mubr.msk.f32.vlgmr.msra.gmra.mxu1 %vm330_vm2, %v6885_v44 }
 0xe21   :  { %5690 = vmatprep.mubr.msk.f32.mxu0 %vm330_vm2, %v6886_v49  ;;  %5701 = vmatprep.mubr.msk.f32.mxu1 %vm330_vm2, %v6887_v59 }
 0xe24   :  { %5691 = vmatmul.mubr.msk.f32.vlgmr.msra.gmra.mxu0 %vm330_vm2, %v6888_v1  ;;  %5702 = vmatmul.mubr.msk.f32.gmra.mxu1 %vm330_vm2, %v6889_v35 }
 0xe25   :  { %5693 = vmatprep.mubr.msk.f32.mxu0 %vm330_vm2, %v6890_v28  ;;  %5714 = vmatprep.mubr.msk.f32.mxu1 %vm330_vm2, %v6140_v54  ;;  %v6893_v54 = vld [vmem:[#allocation5_spill] sm:$0xff] }
 0xe28   :  { %5694 = vmatmul.mubr.msk.f32.gmra.mxu0 %vm330_vm2, %v6891_v22 }
 0xe29   :  { %5706 = vmatprep.mubr.msk.f32.mxu0 %vm330_vm2, %v5880_v27 }
 0xe6b   :  { %v2576_v39 = vpop.f32.mrf.mxu1 }
 0xe6c   :  { %v2577_v50 = vadd.f32 %v2576_v39, %v6647_v38 }
 0xe6d   :  { %v5606_v9 = vpop.f32.mrf.mxu1 }
 0xe6e   :  { %v2580_v58 = vadd.f32 %v2577_v50, %v6411_v40 }
 0xe70   :  { %2581 = vst.msk [vmem:[#allocation2] sm:$0xff] %vm76_vm0, %v2580_v58 }
 0xe73   :  { %v2808_v26 = vpop.f32.mrf.mxu1 }
 0xe74   :  { %v2809_v29 = vadd.f32 %v2808_v26, %v6893_v54 }
 0xe75   :  { %v5639_v6 = vpop.f32.mrf.mxu1 }
 0xe76   :  { %3702 = vrot.lane.b32.xlu1 %v2809_v29, %s5917_s11  ;;  %3529 = vrot.lane.b32.xlu0 %v2809_v29, %s5916_s10 }
 0xe77   :  { %5712 = vmatprep.subr.mxu1 %v2809_v29  ;;  %v6664_v20 = vpop.f32.mrf.mxu1 }
 0xe78   :  { %5713 = vmatpush3.msra.mxu1 %v2809_v29 }
 0xe79   :  { %5715 = vmatmul.mubr.msk.f32.vlgmr.msra.gmra.mxu1 %vm330_vm2, %v6156_v57  ;;  %v2967_v40 = vpop.f32.mrf.mxu1 }
 0xe7a   :  { %3794 = vrot.lane.b32.xlu0 %v2809_v29, %s5915_s1  ;;  %5717 = vmatprep.mubr.msk.f32.mxu1 %vm330_vm2, %v6170_v60 }
 0xe7b   :  { %v5655_v24 = vpop.f32.mrf.mxu1 }
 0xe7d   :  { %5718 = vmatmul.mubr.msk.f32.gmra.mxu1 %vm330_vm2, %v6182_v63  ;;  %v2977_v47 = vpop.f32.mrf.mxu1 }
 0xe7e   :  { %5730 = vmatprep.mubr.msk.f32.mxu1 %vm330_vm2, %v6192_v2 }
 0xecc   :  { %v6666_v56 = vpop.f32.mrf.mxu0 }
 0xece   :  { %v2882_v18 = vpop.f32.mrf.mxu0 }
 0xed0   :  { %v5647_v57 = vpop.f32.mrf.mxu0  ;;  %v6668_v23 = vpop.f32.mrf.mxu1 }
 0xed1   :  { %v2983_v41 = vadd.f32 %v5655_v24, %v5647_v57 }
 0xed2   :  { %v2892_v55 = vpop.f32.mrf.mxu0  ;;  %v6670_v37 = vpop.f32.mrf.mxu1 }
 0xed3   :  { %v2978_v60 = vadd.f32 %v2977_v47, %v2892_v55  ;;  %v5882_v47 = vld [vmem:[%s6850_s6 + $0x28] sm:$0xff] }
 0xed4   :  { %v6672_v62 = vpop.f32.mrf.mxu0  ;;  %v5671_v63 = vpop.f32.mrf.mxu1 }
 0xed6   :  { %v3055_v2 = vpop.f32.mrf.mxu0  ;;  %v3157_v17 = vpop.f32.mrf.mxu1 }
 0xed8   :  { %v5663_v30 = vpop.f32.mrf.mxu0  ;;  %v5684_v31 = vpop.f32.mrf.mxu1 }
 0xed9   :  { %v3077_v32 = vadd.f32 %v5663_v30, %v2983_v41  ;;  %v5883_v41 = vld [vmem:[%s6850_s6 + $0x38] sm:$0xff]  ;;  %v5886_v30 = vld [vmem:[%s6850_s6 + $0x70] sm:$0xff] }
 0xeda   :  { %v3065_v33 = vpop.f32.mrf.mxu0  ;;  %v3325_v44 = vpop.f32.mrf.mxu1 }
 0xedb   :  { %v3076_v21 = vadd.f32 %v3065_v33, %v2978_v60  ;;  %v6674_v49 = vadd.f32 %v5671_v63, %v3077_v32  ;;  %v2968_v32 = vadd.f32 %v2967_v40, %v2882_v18  ;;  %v5889_v40 = vld [vmem:[%s6850_s6 + $0x50] sm:$0xff]  ;;  %v2973_v18 = vadd.f32 %v6664_v20, %v6666_v56 }
 0xedc   :  { %v5676_v59 = vpop.f32.mrf.mxu0  ;;  %v5687_v1 = vpop.f32.mrf.mxu1 }
 0xedd   :  { %v6676_v35 = vadd.f32 %v3157_v17, %v3076_v21  ;;  %v5884_v17 = vld [vmem:[%s6850_s6 + $0x68] sm:$0xff]  ;;  %v3331_v33 = vadd.f32 %v5684_v31, %v5676_v59  ;;  %v3074_v31 = vadd.f32 %v3055_v2, %v2968_v32 }
 0xede   :  { %v3240_v4 = vpop.f32.mrf.mxu0  ;;  %v3335_v19 = vpop.f32.mrf.mxu1  ;;  %v5887_v21 = vld [vmem:[%s6850_s6 + $0x48] sm:$0xff] }
 0xedf   :  { %v3326_v29 = vadd.f32 %v3325_v44, %v3240_v4  ;;  %v5890_v4 = vld [vmem:[%s6850_s6 + $0x58] sm:$0xff]  ;;  %v3166_v20 = vadd.f32 %v6670_v37, %v3074_v31 }
 0xee0   :  { %v5679_v28 = vpop.f32.mrf.mxu0  ;;  %v5700_v39 = vpop.f32.mrf.mxu1 }
 0xee1   :  { %v3341_v22 = vadd.f32 %v5687_v1, %v5679_v28  ;;  %v5888_v1 = vld [vmem:[%s6850_s6 + $0x78] sm:$0xff] }
 0xee2   :  { %v3250_v27 = vpop.f32.mrf.mxu0  ;;  %v3505_v58 = vpop.f32.mrf.mxu1 }
 0xee3   :  { %v6678_v52 = vadd.f32 %v3335_v19, %v3250_v27  ;;  %v3075_v19 = vadd.f32 %v6672_v62, %v2973_v18 }
 0xee4   :  { %v5692_v50 = vpop.f32.mrf.mxu0  ;;  %v5703_v57 = vpop.f32.mrf.mxu1 }
 0xee5   :  { %v3433_v59 = vadd.f32 %v5692_v50, %v3331_v33  ;;  %v3167_v2 = vadd.f32 %v6668_v23, %v3075_v19 }
 0xee6   :  { %v3413_v9 = vpop.f32.mrf.mxu0  ;;  %v6743_v37 = vpop.f32.mrf.mxu1 }
 0xee7   :  { %v3432_v63 = vadd.f32 %v3413_v9, %v3326_v29  ;;  %v3525_v56 = vadd.f32 %v5700_v39, %v3433_v59 }
 0xee8   :  { %v3530_v26 = vpop.permute.xlu0 %3529  ;;  %v5695_v54 = vpop.f32.mrf.mxu0 }
 0xee9   :  { %5704 = vmatprep.subr.mxu0 %v3530_v26  ;;  %v3703_v6 = vpop.permute.xlu1 %3702  ;;  %v3435_v24 = vadd.f32 %v5695_v54, %v3341_v22  ;;  %v3524_v44 = vadd.f32 %v3505_v58, %v3432_v63 }
 0xeea   :  { %5705 = vmatpush3.msra.mxu0 %v3530_v26  ;;  %v6745_v22 = vpop.f32.mrf.mxu0 }
 0xeeb   :  { %5707 = vmatmul.mubr.msk.f32.vlgmr.msra.gmra.mxu0 %vm330_vm2, %v5882_v47  ;;  %5720 = vmatprep.subr.mxu0 %v3703_v6  ;;  %v6686_v60 = vadd.f32 %v5703_v57, %v3435_v24 }
 0xeec   :  { %5721 = vmatpush3.msra.mxu0 %v3703_v6  ;;  %v3795_v55 = vpop.permute.xlu0 %3794  ;;  %5709 = vmatprep.mubr.msk.f32.mxu0 %vm330_vm2, %v6619_v61  ;;  %v5885_v61 = vld [vmem:[%s6850_s6 + $0x40] sm:$0xff]  ;;  %s5918_s6 = smov [#allocation2]  }
 0xeed   :  { %5728 = vmatprep.subr.mxu1 %v3795_v55  ;;  %5736 = vmatprep.subr.mxu0 %v6882_v36  ;;  %s5004_s24 = sshll.u32 %s5918_s6, 4  ;;  %s5005_s24 = int_to_ptr.vmem [resolvable:$true] %s5004_s24 }
 0xeee   :  { %5729 = vmatpush3.msra.mxu1 %v3795_v55  ;;  %s5891_s25 = scalar_lea.vmem %s5005_s24, 256  ;;  %p5896_p1 = scmp.lt.s32.totalorder %s5005_s24, %s5005_s24 }
 0xeef   :  { %5710 = vmatmul.mubr.msk.f32.gmra.mxu0 %vm330_vm2, %v5883_v41  ;;  %5731 = vmatmul.mubr.msk.f32.vlgmr.msra.gmra.mxu1 %vm330_vm2, %v5884_v17  ;;  %p5892_p0 = scmp.ne.s32.totalorder %s5005_s24, %s5891_s25  ;;  %p5897_p2 = scmp.lt.s32.totalorder %s5891_s25, %s5891_s25 }
 0xef0   :  { %5722 = vmatprep.mubr.msk.f32.mxu0 %vm330_vm2, %v5885_v61  ;;  %5733 = vmatprep.mubr.msk.f32.mxu1 %vm330_vm2, %v5886_v30 }
 0xef1   :  { %5741 = vmatprep.subr.mxu1 %v6882_v36  ;;  %p5898_p3 = por %p5897_p2, %p5896_p1 }
 0xef3   :  { %5723 = vmatmul.mubr.msk.f32.vlgmr.msra.gmra.mxu0 %vm330_vm2, %v5887_v21  ;;  %5734 = vmatmul.mubr.msk.f32.gmra.mxu1 %vm330_vm2, %v5888_v1  ;;  %p5899_p4 = pnand %p5898_p3, %p5892_p0 }
 0xef4   :  { %5737 = vmatpush3.xpose.msk.msra.mxu0 %vm330_vm2, %v3524_v44  ;;  %5725 = vmatprep.mubr.msk.f32.mxu0 %vm330_vm2, %v5889_v40 }
 0xef5   :  { %5746 = vmatprep.subr.mxu0 %v6882_v36  ;;  %5743 = vmatprep.mubr.msk.f32.mxu1 %vm5914_vm1, %v6882_v36 }
 0xef7   :  { %5726 = vmatmul.mubr.msk.f32.gmra.mxu0 %vm330_vm2, %v5890_v4 }
 0xef8   :  { %5738 = vmatprep.mubr.msk.f32.mxu0 %vm5914_vm1, %v6882_v36 }
 0xefb   :  { %5739 = vmatmul.mubr.msk.f32.vlgmr.msra.gmra.mxu0 %vm330_vm2, %v3166_v20 }
 0xefc   :  { %5747 = vmatpush3.xpose.msk.msra.mxu0 %vm330_vm2, %v3525_v56  ;;  %5748 = vmatprep.mubr.msk.f32.mxu0 %vm5914_vm1, %v6882_v36 }
 0xefd   :  { %5756 = vmatprep.subr.mxu0 %v6882_v36 }
 0xeff   :  { %5749 = vmatmul.mubr.msk.f32.vlgmr.msra.gmra.mxu0 %vm330_vm2, %v3167_v2 }
 0xf00   :  { %5757 = vmatpush3.msra.mxu0 %v6339_v45  ;;  %5758 = vmatprep.mubr.msk.f32.mxu0 %vm5914_vm1, %v6882_v36 }
 0xf01   :  { %5766 = vmatprep.subr.mxu0 %v6882_v36 }
 0xf39   :  { %v5716_v62 = vpop.f32.mrf.mxu1 }
 0xf3b   :  { %v3683_v28 = vpop.f32.mrf.mxu1 }
 0xf3d   :  { %v5719_v27 = vpop.f32.mrf.mxu1 }
 0xf3f   :  { %v3693_v50 = vpop.f32.mrf.mxu1 }
 0xfab   :  { %v5708_v39 = vpop.f32.mrf.mxu0 }
 0xfac   :  { %v3689_v54 = vadd.f32 %v5716_v62, %v5708_v39 }
 0xfad   :  { %v3598_v23 = vpop.f32.mrf.mxu0 }
 0xfae   :  { %v3684_v24 = vadd.f32 %v3683_v28, %v3598_v23 }
 0xfaf   :  { %v5711_v9 = vpop.f32.mrf.mxu0  ;;  %v5732_v58 = vpop.f32.mrf.mxu1 }
 0xfb0   :  { %v3699_v55 = vadd.f32 %v5719_v27, %v5711_v9 }
 0xfb1   :  { %v3608_v26 = vpop.f32.mrf.mxu0  ;;  %v3863_v6 = vpop.f32.mrf.mxu1 }
 0xfb2   :  { %v3694_v45 = vadd.f32 %v3693_v50, %v3608_v26 }
 0xfb3   :  { %v5724_v29 = vpop.f32.mrf.mxu0  ;;  %v5735_v61 = vpop.f32.mrf.mxu1 }
 0xfb4   :  { %v3791_v47 = vadd.f32 %v5724_v29, %v3689_v54 }
 0xfb5   :  { %v3771_v57 = vpop.f32.mrf.mxu0 }
 0xfb6   :  { %v3790_v63 = vadd.f32 %v3771_v57, %v3684_v24  ;;  %v3883_v41 = vadd.f32 %v5732_v58, %v3791_v47  ;;  %v3873_v47 = vpop.f32.mrf.mxu1  ;;  %v3434_v57 = vadd.f32 %v6745_v22, %v6678_v52 }
 0xfb7   :  { %v5727_v17 = vpop.f32.mrf.mxu0 }
 0xfb8   :  { %v3793_v30 = vadd.f32 %v5727_v17, %v3699_v55  ;;  %v3882_v32 = vadd.f32 %v3863_v6, %v3790_v63 }
 0xfb9   :  { %v3781_v33 = vpop.f32.mrf.mxu0 }
 0xfba   :  { %v3792_v44 = vadd.f32 %v3781_v33, %v3694_v45  ;;  %v6747_v21 = vadd.f32 %v5735_v61, %v3793_v30  ;;  %5742 = vmatpush3.msra.mxu1 %v3882_v32 }
 0xfbb   :  { %v3958_v1 = vpop.f32.mrf.mxu0  ;;  %5751 = vmatprep.subr.mxu1 %v6882_v36 }
 0xfbc   :  { %v3962_v40 = vmul.f32 0.35355338, %v3958_v1  ;;  %v3884_v55 = vadd.f32 %v3873_v47, %v3792_v44 }
 0xfbd   :  { %v5740_v18 = vpop.f32.mrf.mxu0 }
 0xfbe   :  { %v3963_v31 = vsel %vm330_vm2, %v3962_v40, -inf }
 0xfbf   :  { %3964 = vmax.xlane.f32.xlu1 %v3963_v31  ;;  %v4119_v59 = vpop.f32.mrf.mxu0 }
 0xfc0   :  { %v4123_v4 = vmul.f32 0.35355338, %v4119_v59 }
 0xfc1   :  { %v5750_v19 = vpop.f32.mrf.mxu0 }
 0xfc2   :  { %v4124_v20 = vsel %vm330_vm2, %v4123_v4, -inf }
 0xfc3   :  { %4125 = vmax.xlane.f32.xlu0 %v4124_v20 }
0x1048   :  { %v3965_v56 = vpop.xlane.xlu1 %3964 }
0x1049   :  { %v3966_v2 = vsub.f32 %v3962_v40, %v3965_v56 }
0x104b   :  { %v3967_v62 = vmul.f32 1.442695, %v3966_v2 }
0x104c   :  { %v4126_v28 = vpop.xlane.xlu0 %4125 }
0x104d   :  { %5860 = vpow2.f32 %v3967_v62  ;;  %v4127_v27 = vsub.f32 %v4123_v4, %v4126_v28 }
0x104f   :  { %v4128_v39 = vmul.f32 1.442695, %v4127_v27 }
0x1051   :  { %5862 = vpow2.f32 %v4128_v39 }
0x105a   :  { %v5861_v23 = vpop.eup %5860 }
0x105b   :  { %v3969_v50 = vsel %vm330_vm2, %v5861_v23, 0.0 }
0x105c   :  { %3970 = vadd.xlane.f32.xlu0 %v3969_v50 }
0x105e   :  { %v5863_v9 = vpop.eup %5862 }
0x105f   :  { %v4130_v58 = vsel %vm330_vm2, %v5863_v9, 0.0 }
0x1060   :  { %4131 = vadd.xlane.f32.xlu1 %v4130_v58 }
0x10e5   :  { %v3971_v26 = vpop.xlane.xlu0 %3970 }
0x10e6   :  { %5864 = vrcp.f32 %v3971_v26 }
0x10e9   :  { %v4132_v54 = vpop.xlane.xlu1 %4131 }
0x10ea   :  { %5866 = vrcp.f32 %v4132_v54 }
0x10f3   :  { %v5865_v45 = vpop.eup %5864 }
0x10f4   :  { %v3973_v29 = vmul.f32 %v5865_v45, %v5861_v23 }
0x10f6   :  { %5744 = vmatmul.mubr.msk.f32.vlgmr.msra.gmra.mxu1 %vm330_vm2, %v3973_v29 }
0x10f7   :  { %v5867_v6 = vpop.eup %5866  ;;  %5752 = vmatpush3.msra.mxu1 %v3883_v41  ;;  %5753 = vmatprep.mubr.msk.f32.mxu1 %vm5914_vm1, %v6882_v36 }
0x10f8   :  { %v4134_v24 = vmul.f32 %v5867_v6, %v5863_v9  ;;  %5761 = vmatprep.subr.mxu1 %v6882_v36 }
0x10fa   :  { %5754 = vmatmul.mubr.msk.f32.vlgmr.msra.gmra.mxu1 %vm330_vm2, %v4134_v24 }
0x10fb   :  { %5762 = vmatpush3.msra.mxu1 %v6329_v46  ;;  %5763 = vmatprep.mubr.msk.f32.mxu1 %vm5914_vm1, %v6882_v36  ;;  %v3526_v46 = vadd.f32 %v6743_v37, %v3434_v57 }
0x10fc   :  { %5771 = vmatprep.subr.mxu1 %v6882_v36 }
0x11b6   :  { %v4043_v63 = vpop.f32.mrf.mxu1 }
0x11b7   :  { %5764 = vmatmul.mubr.msk.f32.vlgmr.msra.gmra.mxu1 %vm330_vm2, %v4043_v63 }
0x11b8   :  { %5772 = vmatpush3.msra.mxu1 %v3884_v55  ;;  %v5745_v41 = vpop.f32.mrf.mxu1  ;;  %5773 = vmatprep.mubr.msk.f32.mxu1 %vm5914_vm1, %v6882_v36 }
0x11b9   :  { %5781 = vmatprep.subr.mxu1 %v6882_v36 }
0x11ba   :  { %v4204_v17 = vpop.f32.mrf.mxu1 }
0x11bb   :  { %5759 = vmatmul.mubr.msk.f32.vlgmr.msra.gmra.mxu0 %vm330_vm2, %v4204_v17 }
0x11bc   :  { %5767 = vmatpush3.xpose.msk.msra.mxu0 %vm330_vm2, %v3526_v46  ;;  %v5755_v61 = vpop.f32.mrf.mxu1  ;;  %5768 = vmatprep.mubr.msk.f32.mxu0 %vm5914_vm1, %v6882_v36 }
0x11bd   :  { %5776 = vmatprep.subr.mxu0 %v6882_v36 }
0x11bf   :  { %5769 = vmatmul.mubr.msk.f32.vlgmr.msra.gmra.mxu0 %vm330_vm2, %v6676_v35 }
0x11c0   :  { %5777 = vmatpush3.msra.mxu0 %v6362_v16  ;;  %5778 = vmatprep.mubr.msk.f32.mxu0 %vm5914_vm1, %v6882_v36 }
0x11c1   :  { %5786 = vmatprep.subr.mxu0 %v6882_v36 }
0x1277   :  { %v4350_v52 = vpop.f32.mrf.mxu1 }
0x1279   :  { %v5765_v37 = vpop.f32.mrf.mxu1 }
0x127b   :  { %v4277_v22 = vpop.f32.mrf.mxu0 }
0x127c   :  { %v4351_v30 = vadd.f32 %v4350_v52, %v4277_v22 }
0x127d   :  { %v5760_v32 = vpop.f32.mrf.mxu0 }
0x127f   :  { %v4426_v33 = vpop.f32.mrf.mxu0 }
0x1280   :  { %v4430_v44 = vmul.f32 0.35355338, %v4426_v33 }
0x1281   :  { %v5770_v1 = vpop.f32.mrf.mxu0 }
0x1282   :  { %v4431_v40 = vsel %vm330_vm2, %v4430_v44, -inf }
0x1283   :  { %4432 = vmax.xlane.f32.xlu0 %v4431_v40 }
0x130c   :  { %v4433_v18 = vpop.xlane.xlu0 %4432 }
0x130d   :  { %v4434_v35 = vsub.f32 %v4430_v44, %v4433_v18 }
0x130f   :  { %v4435_v31 = vmul.f32 1.442695, %v4434_v35 }
0x1311   :  { %5868 = vpow2.f32 %v4435_v31 }
0x131e   :  { %v5869_v16 = vpop.eup %5868 }
0x131f   :  { %v4437_v59 = vsel %vm330_vm2, %v5869_v16, 0.0 }
0x1320   :  { %4438 = vadd.xlane.f32.xlu1 %v4437_v59 }
0x13a9   :  { %v4439_v4 = vpop.xlane.xlu1 %4438 }
0x13aa   :  { %5870 = vrcp.f32 %v4439_v4 }
0x13b7   :  { %v5871_v19 = vpop.eup %5870 }
0x13b8   :  { %v4441_v20 = vmul.f32 %v5871_v19, %v5869_v16 }
0x13ba   :  { %5774 = vmatmul.mubr.msk.f32.vlgmr.msra.gmra.mxu1 %vm330_vm2, %v4441_v20 }
0x13bb   :  { %5782 = vmatpush3.xpose.msk.msra.mxu1 %vm330_vm2, %v6686_v60  ;;  %5783 = vmatprep.mubr.msk.f32.mxu1 %vm5914_vm1, %v6882_v36 }
0x13bc   :  { %5791 = vmatprep.subr.mxu1 %v6882_v36 }
0x13be   :  { %5784 = vmatmul.mubr.msk.f32.vlgmr.msra.gmra.mxu1 %vm330_vm2, %v6674_v49 }
0x13bf   :  { %5792 = vmatpush3.msra.mxu1 %v6389_v3  ;;  %5793 = vmatprep.mubr.msk.f32.mxu1 %vm5914_vm1, %v6882_v36 }
0x13c0   :  { %5807 = vmatprep.subr.mxu1 %v6882_v36 }
0x147a   :  { %v4511_v56 = vpop.f32.mrf.mxu1 }
0x147b   :  { %5779 = vmatmul.mubr.msk.f32.vlgmr.msra.gmra.mxu0 %vm330_vm2, %v4511_v56 }
0x147c   :  { %5787 = vmatpush3.msra.mxu0 %v6747_v21  ;;  %v5775_v60 = vpop.f32.mrf.mxu1  ;;  %5788 = vmatprep.mubr.msk.f32.mxu0 %vm5914_vm1, %v6882_v36 }
0x147d   :  { %5796 = vmatprep.subr.mxu0 %v6882_v36 }
0x147e   :  { %v4661_v2 = vpop.f32.mrf.mxu1 }
0x147f   :  { %v4665_v49 = vmul.f32 0.35355338, %v4661_v2 }
0x1480   :  { %v5785_v62 = vpop.f32.mrf.mxu1 }
0x1481   :  { %v4666_v3 = vsel %vm330_vm2, %v4665_v49, -inf }
0x1482   :  { %4667 = vmax.xlane.f32.xlu0 %v4666_v3 }
0x150b   :  { %v4668_v28 = vpop.xlane.xlu0 %4667 }
0x150c   :  { %v4669_v27 = vsub.f32 %v4665_v49, %v4668_v28 }
0x150e   :  { %v4670_v39 = vmul.f32 1.442695, %v4669_v27 }
0x1510   :  { %5872 = vpow2.f32 %v4670_v39 }
0x151d   :  { %v5873_v23 = vpop.eup %5872 }
0x151e   :  { %v4672_v50 = vsel %vm330_vm2, %v5873_v23, 0.0 }
0x151f   :  { %4673 = vadd.xlane.f32.xlu1 %v4672_v50 }
0x153b   :  { %v4584_v21 = vpop.f32.mrf.mxu0 }
0x153c   :  { %v4588_v9 = vadd.f32 %v4584_v21, %v4351_v30 }
0x153d   :  { %v5780_v58 = vpop.f32.mrf.mxu0 }
0x15a8   :  { %v4674_v26 = vpop.xlane.xlu1 %4673 }
0x15a9   :  { %5874 = vrcp.f32 %v4674_v26 }
0x15b6   :  { %v5875_v54 = vpop.eup %5874 }
0x15b7   :  { %v4676_v45 = vmul.f32 %v5875_v54, %v5873_v23 }
0x15b9   :  { %5789 = vmatmul.mubr.msk.f32.vlgmr.msra.gmra.mxu0 %vm330_vm2, %v4676_v45 }
0x15ba   :  { %5797 = vmatpush3.msra.mxu0 %v6420_v42  ;;  %5804 = vmatprep.mubr.msk.f32.mxu0 %vm5914_vm1, %v6882_v36 }
0x15bb   :  { %5798 = vmatprep.subr.mxu0 %v6882_v36 }
0x15bc   :  { %5799 = vmatpush3.msra.mxu0 %v6426_v0 }
0x15bd   :  { %5800 = vmatprep.subr.mxu0 %v6882_v36 }
0x15be   :  { %5801 = vmatpush3.msra.mxu0 %v6432_v43 }
0x15bf   :  { %5802 = vmatprep.subr.mxu0 %v6882_v36 }
0x15c0   :  { %5803 = vmatpush3.msra.mxu0 %v6439_v48 }
0x1679   :  { %v4746_v29 = vpop.f32.mrf.mxu0 }
0x167a   :  { %5794 = vmatmul.mubr.msk.f32.vlgmr.msra.gmra.mxu1 %vm330_vm2, %v4746_v29 }
0x167b   :  { %v5790_v6 = vpop.f32.mrf.mxu0  ;;  %5808 = vmatpush3.msra.mxu1 %v6488_v7  ;;  %5823 = vmatprep.mubr.msk.f32.mxu1 %vm5914_vm1, %v6882_v36 }
0x167c   :  { %5809 = vmatprep.subr.mxu1 %v6882_v36 }
0x167d   :  { %5810 = vmatpush3.msra.mxu1 %v6495_v8 }
0x167e   :  { %5811 = vmatprep.subr.mxu1 %v6882_v36 }
0x167f   :  { %5812 = vmatpush3.msra.mxu1 %v6502_v10 }
0x1680   :  { %5813 = vmatprep.subr.mxu1 %v6882_v36 }
0x1681   :  { %5814 = vmatpush3.msra.mxu1 %v6507_v11 }
0x1682   :  { %5815 = vmatprep.subr.mxu1 %v6882_v36 }
0x1683   :  { %5816 = vmatpush3.msra.mxu1 %v6516_v12 }
0x1684   :  { %5817 = vmatprep.subr.mxu1 %v6882_v36 }
0x1685   :  { %5818 = vmatpush3.msra.mxu1 %v6521_v13 }
0x1686   :  { %5819 = vmatprep.subr.mxu1 %v6882_v36 }
0x1687   :  { %5820 = vmatpush3.msra.mxu1 %v6528_v14 }
0x1688   :  { %5821 = vmatprep.subr.mxu1 %v6882_v36 }
0x1689   :  { %5822 = vmatpush3.msra.mxu1 %v6535_v15 }
0x173a   :  { %v4819_v42 = vpop.f32.mrf.mxu1 }
0x173b   :  { %v4823_v0 = vadd.f32 %v4819_v42, %v4588_v9 }
0x173c   :  { %v5795_v43 = vpop.f32.mrf.mxu1 }
0x173d   :  { %v4824_v48 = vadd.f32 %v4823_v0, %v6407_v5 }
0x173f   :  { %v4825_v7 = vadd.f32 %v6395_v51, %v4824_v48 }
0x1741   :  { %v4826_v8 = vsel %vm76_vm0, %v4825_v7, 0.0 }
0x1742   :  { %4827 = vadd.xlane.f32.xlu0 %v4826_v8 }
0x17cb   :  { %v4828_v10 = vpop.xlane.xlu0 %4827 }
0x17cc   :  { %v4829_v11 = vmul.f32 0.03125, %v4828_v10 }
0x17ce   :  { %v4830_v12 = vsub.f32 %v4825_v7, %v4829_v11 }
0x17d0   :  { %v4831_v13 = vmul.f32 %v4830_v12, %v4830_v12 }
0x17d2   :  { %v4832_v14 = vsel %vm76_vm0, %v4831_v13, 0.0 }
0x17d3   :  { %4833 = vadd.xlane.f32.xlu1 %v4832_v14 }
0x185c   :  { %v4834_v36 = vpop.xlane.xlu1 %4833 }
0x185d   :  { %v4835_v24 = vmul.f32 0.03125, %v4834_v36 }
0x185f   :  { %v4836_v15 = vadd.f32 1e-05, %v4835_v24 }
0x1861   :  { %5876 = vrsqrt.f32 %v4836_v15 }
0x186e   :  { %v5877_v47 = vpop.eup %5876 }
0x186f   :  { %v4838_v57 = vmul.f32 %v5877_v47, %v4830_v12 }
0x1871   :  { %v4839_v5 = vmul.f32 %v4838_v57, %v6448_v25 }
0x1873   :  { %v4840_v51 = vadd.f32 %v4839_v5, %v6451_v53 }
0x1875   :  { %5805 = vmatmul.mubr.msk.f32.vlgmr.msra.gmra.mxu0 %vm76_vm0, %v4840_v51 }
0x1935   :  { %v4910_v55 = vpop.f32.mrf.mxu0 }
0x1936   :  { %v4911_v63 = vadd.f32 %v4910_v55, %v6549_v34 }
0x1937   :  { %v5806_v41 = vpop.f32.mrf.mxu0 }
0x1938   :  { %v4915_v46 = vmul.f32 0.044715, %v4911_v63  ;;  %v4914_v30 = vmul.f32 0.5, %v4911_v63 }
0x193a   :  { %v4916_v17 = vmul.f32 %v4915_v46, %v4911_v63 }
0x193c   :  { %v4917_v61 = vmul.f32 %v4916_v17, %v4911_v63 }
0x193e   :  { %v4918_v52 = vadd.f32 %v4917_v61, %v4911_v63 }
0x1940   :  { %v4919_v37 = vmul.f32 0.7978846, %v4918_v52 }
0x1942   :  { %5878 = vtanh.f32 %v4919_v37 }
0x194f   :  { %v5879_v22 = vpop.eup %5878 }
0x1950   :  { %v4921_v32 = vadd.f32 1.0, %v5879_v22 }
0x1952   :  { %v4922_v33 = vmul.f32 %v4921_v32, %v4914_v30 }
0x1954   :  { %5824 = vmatmul.mubr.msk.f32.vlgmr.msra.gmra.mxu1 %vm2506_vm3, %v4922_v33 }
0x1a14   :  { %v4992_v25 = vpop.f32.mrf.mxu1 }
0x1a15   :  { %v4993_v53 = vadd.f32 %v4992_v25, %v6647_v38 }
0x1a16   :  { %v5825_v44 = vpop.f32.mrf.mxu1 }
0x1a17   :  { %v4996_v34 = vadd.f32 %v4993_v53, %v4825_v7 }
0x1a19   :  { %4998 = vst.msk [vmem:[#allocation2 + $0x8] sm:$0xff] %vm76_vm0, %v4996_v34 }
0x1a1a   :  { %5902 = shalt.err (!%p5899_p4)
}
0x1a1b   :  { %s5919_s26 = smov 128   ;;  %s5920_s27 = smov 8  }
0x1a1c   :  { %5010 = dma.vmem_to_hbm [thread:$0]  %s5005_s24, 256, %s6851_s7, [#allocation3], %s5919_s26, %s5919_s26, %s5920_s27  }
0x1a1d   :  { %5911 = dma.done.wait [#allocation3], 256  }
0x1a1e   :  { %5912 = vsyncadd [#allocation3], 4294967040 }
0x1a1f   :  { %5014 = vsyncpa [#allocation3], 1 }

</bundles_post_ra>
